<compile_context>
chip_gen: v7x
topology: tpu7x:2x2x1
jax: 0.10.0
libtpu: 0.0.40
codegen_flags: <defaults>
</compile_context>

<pallas_src>
import functools

import jax
import jax.numpy as jnp
from jax import lax
from jax.experimental import pallas as pl
from jax.experimental.pallas import tpu as pltpu

N_BINS = 15
_NEG_INF = -1e30


def _round_up(x, m):
    return ((x + m - 1) // m) * m


def _vmem_limit(bytes_needed):
    # explicit scoped-VMEM limit, clamped so it is safe on v5e/v6e/v7x
    return int(min(32 * 1024 * 1024, max(4 * 1024 * 1024, 2 * bytes_needed)))


# ---------------------------------------------------------------------------
# Kernel 1: per-sample stats from class-major logits.
#   in : logits_T  [C_pad, N_TILE]   (classes on sublanes, samples on lanes)
#   out: conf [1, N_TILE]  max softmax probability
#        choice [1, N_TILE] argmax class (first index on ties, like torch.max)
#        lse  [1, N_TILE]  log-sum-exp (lets kernel 2 recompute softmax tiles)
# ---------------------------------------------------------------------------
def _stats_kernel(xt_ref, conf_ref, choice_ref, lse_ref):
    x = xt_ref[...]                                        # [C_pad, TN] f32
    m = jnp.max(x, axis=0, keepdims=True)                  # [1, TN]
    s = jnp.sum(jnp.exp(x - m), axis=0, keepdims=True)     # [1, TN]
    lse = m + jnp.log(s)
    lse_ref[...] = lse
    conf_ref[...] = jnp.exp(m - lse)                       # max softmax prob
    c_pad = x.shape[0]
    cidx = lax.broadcasted_iota(jnp.int32, x.shape, 0)
    choice_ref[...] = jnp.min(jnp.where(x == m, cidx, c_pad),
                              axis=0, keepdims=True)


# ---------------------------------------------------------------------------
# Kernel 2: per-class, per-bin masked reductions -> per-class SCE / diff / acc
#   grid = (class tiles ["parallel"], sample tiles ["arbitrary" reduction])
# ---------------------------------------------------------------------------
def _class_ece_kernel(xt_ref, lse_ref, lab_ref, ch_ref, edges_ref,
                      out_ref, bins_acc, cc_acc, *, n_valid, n_bins):
    i = pl.program_id(0)                                   # class tile
    j = pl.program_id(1)                                   # sample tile
    nj = pl.num_programs(1)

    x = xt_ref[...]                                        # [C_TILE, TN] f32
    lse = lse_ref[...]                                     # [1, TN]
    labels = lab_ref[...]                                  # [1, TN] int32
    choices = ch_ref[...]                                  # [1, TN] int32
    c_tile, tn = x.shape

    # recompute this class tile of softmax probabilities (saves an HBM pass)
    sm = jnp.exp(x - lse)                                  # [C_TILE, TN]

    class_ids = i * c_tile + lax.broadcasted_iota(jnp.int32, (c_tile, 1), 0)
    lab_eq = (labels == class_ids).astype(jnp.float32)     # [C_TILE, TN]
    ch_eq = (choices == class_ids).astype(jnp.float32)

    # mask out padded sample columns (labels are padded with -1 as well)
    col = j * tn + lax.broadcasted_iota(jnp.int32, (1, tn), 1)
    valid = (col < n_valid).astype(jnp.float32)            # [1, TN]

    @pl.when(j == 0)
    def _():
        bins_acc[...] = jnp.zeros_like(bins_acc)
        cc_acc[...] = jnp.zeros_like(cc_acc)

    # class_count / class_correct, stacked on the sublane axis -> [2*C_TILE, 1]
    cc_acc[...] += jnp.concatenate(
        [jnp.sum(lab_eq, axis=1, keepdims=True),
         jnp.sum(lab_eq * ch_eq, axis=1, keepdims=True)], axis=0)

    # Unrolled bin loop over a [C_TILE, TN] working set.  Per bin, stack
    # [mask; conf*mask; label*mask] on sublanes and do a single lane reduce.
    lane_bins = lax.broadcasted_iota(jnp.int32, (1, n_bins), 1)
    update = jnp.zeros((3 * c_tile, n_bins), jnp.float32)
    for b in range(n_bins):                                # static unroll (15)
        low = edges_ref[b]
        up = edges_ref[b + 1]
        in_f = jnp.where(jnp.logical_and(sm > low, sm <= up), valid, 0.0)
        stacked = jnp.concatenate([in_f, sm * in_f, lab_eq * in_f], axis=0)
        colb = jnp.sum(stacked, axis=1, keepdims=True)     # [3*C_TILE, 1]
        update = update + jnp.where(lane_bins == b, colb, 0.0)
    bins_acc[...] += update                                # [3*C_TILE, NB]

    @pl.when(j == nj - 1)
    def _():
        ba = bins_acc[...]
        cnt = ba[0:c_tile]                                 # [C_TILE, NB]
        sconf = ba[c_tile:2 * c_tile]
        slab = ba[2 * c_tile:3 * c_tile]
        has = cnt > 0.0
        inv_cnt = pl.reciprocal(jnp.where(has, cnt, 1.0), approx=True)
        diff = jnp.where(has, (sconf - slab) * inv_cnt, 0.0)
        prop = cnt * (1.0 / n_valid)
        sce = jnp.sum(jnp.abs(diff) * prop, axis=1, keepdims=True)   # [C_TILE,1]
        cad = jnp.sum(diff * prop, axis=1, keepdims=True)

        cc = cc_acc[...]
        ccount = cc[0:c_tile]
        ccorr = cc[c_tile:2 * c_tile]
        has_c = ccount > 0.0
        acc = jnp.where(
            has_c,
            ccorr * pl.reciprocal(jnp.where(has_c, ccount, 1.0), approx=True),
            0.0)

        li = lax.broadcasted_iota(jnp.int32, (1, 3), 1)
        out_ref[...] = jnp.where(li == 0, sce, jnp.where(li == 1, cad, acc))


# ---------------------------------------------------------------------------
# Wrapper
# ---------------------------------------------------------------------------
@functools.partial(jax.jit, static_argnames=("n_bins", "is_logits"))
def _class_ece_device(logits, labels, n_bins, is_logits):
    N, C = logits.shape

    x = logits.astype(jnp.float32)
    if not is_logits:
        # probabilities in: log-probs act like logits (exact for normalized p)
        x = jnp.log(jnp.maximum(x, 1e-30))

    # ---- tiling: multiples of the (8, 128) vreg tile, VMEM-bounded --------
    c_tile = min(128, _round_up(C, 8))
    c_pad = _round_up(C, c_tile)
    n_tile = min(512, _round_up(N, 128))
    if c_pad * n_tile * 8 > 8 * 1024 * 1024:     # keep k1 blocks small for huge C
        n_tile = 128
    n_pad = _round_up(N, n_tile)

    if c_pad > C:
        x = jnp.pad(x, ((0, 0), (0, c_pad - C)), constant_values=_NEG_INF)
    if n_pad > N:
        x = jnp.pad(x, ((0, n_pad - N), (0, 0)), constant_values=0.0)
    xt = jnp.transpose(x)                        # [c_pad, n_pad] class-major

    lab = labels.astype(jnp.int32).reshape(1, N)
    if n_pad > N:
        lab = jnp.pad(lab, ((0, 0), (0, n_pad - N)), constant_values=-1)

    # ---- kernel 1: per-sample confidence / choice / log-sum-exp -----------
    conf, choices, lse = pl.pallas_call(
        _stats_kernel,
        grid=(n_pad // n_tile,),
        in_specs=[pl.BlockSpec((c_pad, n_tile), lambda i: (0, i))],
        out_specs=(pl.BlockSpec((1, n_tile), lambda i: (0, i)),
                   pl.BlockSpec((1, n_tile), lambda i: (0, i)),
                   pl.BlockSpec((1, n_tile), lambda i: (0, i))),
        out_shape=(jax.ShapeDtypeStruct((1, n_pad), jnp.float32),
                   jax.ShapeDtypeStruct((1, n_pad), jnp.int32),
                   jax.ShapeDtypeStruct((1, n_pad), jnp.float32)),
        compiler_params=pltpu.CompilerParams(
            dimension_semantics=("parallel",),
            vmem_limit_bytes=_vmem_limit(6 * c_pad * n_tile * 4)),
    )(xt)

    # ---- glue: equal-count bin edges (histedges_equalN + histogram edges) --
    sorted_conf = jnp.sort(conf[0, :N])
    q = jnp.linspace(0.0, float(N), n_bins + 1)
    edges = jnp.interp(q, jnp.arange(N, dtype=jnp.float32),
                       sorted_conf).astype(jnp.float32)      # (n_bins + 1,)

    # ---- kernel 2: per-class / per-bin reductions --------------------------
    kernel2 = functools.partial(_class_ece_kernel, n_valid=N, n_bins=n_bins)
    out = pl.pallas_call(
        kernel2,
        grid=(c_pad // c_tile, n_pad // n_tile),
        in_specs=[pl.BlockSpec((c_tile, n_tile), lambda i, j: (i, j)),   # logits_T
                  pl.BlockSpec((1, n_tile), lambda i, j: (0, j)),        # lse
                  pl.BlockSpec((1, n_tile), lambda i, j: (0, j)),        # labels
                  pl.BlockSpec((1, n_tile), lambda i, j: (0, j)),        # choices
                  pl.BlockSpec(memory_space=pltpu.MemorySpace.SMEM)],    # edges
        out_specs=pl.BlockSpec((c_tile, 3), lambda i, j: (i, 0)),
        out_shape=jax.ShapeDtypeStruct((c_pad, 3), jnp.float32),
        scratch_shapes=[pltpu.VMEM((3 * c_tile, n_bins), jnp.float32),
                        pltpu.VMEM((2 * c_tile, 1), jnp.float32)],
        compiler_params=pltpu.CompilerParams(
            dimension_semantics=("parallel", "arbitrary"),
            vmem_limit_bytes=_vmem_limit(12 * c_tile * n_tile * 4)),
    )(xt, lse, lab, choices, edges)

    return out[:C, 0], out[:C, 1], out[:C, 2]


def class_ece_loss(logits, labels, n_bins=N_BINS, is_logits=True):
    """Pallas equivalent of ClassECELoss.forward(logits, labels, is_logits)."""
    sce, cad, acc = _class_ece_device(logits, labels, n_bins=n_bins,
                                      is_logits=is_logits)
    # single scalar host sync: only slices the tiny per-class results
    # (kernels are compiled for the static class dim, no recompilation).
    num_classes = int(jax.device_get(jnp.max(labels))) + 1
    per_class_sce = sce[:num_classes]
    conf_acc_diffs = cad[:num_classes]
    classes_acc = [float(v) for v in jax.device_get(acc[:num_classes])]
    return per_class_sce, classes_acc, conf_acc_diffs


# ---------------------------------------------------------------------------
# Pure-JAX reference (mirrors the PyTorch module; small sizes only)
# ---------------------------------------------------------------------------
def _reference(logits, labels, n_bins=N_BINS):
    sm = jax.nn.softmax(logits.astype(jnp.float32), axis=1)
    conf = jnp.max(sm, axis=1)
    choices = jnp.argmax(sm, axis=1)
    n = logits.shape[0]
    sorted_conf = jnp.sort(conf)
    q = jnp.linspace(0.0, float(n), n_bins + 1)
    edges = jnp.interp(q, jnp.arange(n, dtype=jnp.float32), sorted_conf)
    num_classes = int(jax.device_get(jnp.max(labels))) + 1
    sces, cads, accs = [], [], []
    for i in range(num_classes):
        cc = sm[:, i]
        lab_eq = labels == i
        class_acc = jnp.sum((choices == i) & lab_eq) / jnp.sum(lab_eq)
        sce = jnp.float32(0.0)
        cad = jnp.float32(0.0)
        for b in range(n_bins):
            in_bin = (cc > edges[b]) & (cc <= edges[b + 1])
            cnt = jnp.sum(in_bin.astype(jnp.float32))
            prop = cnt / n
            safe = jnp.maximum(cnt, 1.0)
            acc_in = jnp.sum((lab_eq & in_bin).astype(jnp.float32)) / safe
            avg_conf = jnp.sum(cc * in_bin.astype(jnp.float32)) / safe
            d = jnp.where(cnt > 0, avg_conf - acc_in, 0.0)
            sce = sce + jnp.abs(d) * prop
            cad = cad + d * prop
        sces.append(sce)
        cads.append(cad)
        accs.append(class_acc)
    return jnp.stack(sces), [float(a) for a in accs], jnp.stack(cads)


if __name__ == "__main__":
    key = jax.random.PRNGKey(0)
    N, C = 640, 8          # exercises sample tiling (2 x 512 tiles) + padding
    k1, k2 = jax.random.split(key)
    logits = 2.0 * jax.random.normal(k1, (N, C), dtype=jnp.float32)
    # labels contain every class 0..C-1, so num_classes == C (as in the module)
    labels = jax.random.permutation(k2, jnp.arange(N, dtype=jnp.int32) % C)

    per_class_sce, classes_acc, conf_acc_diffs = class_ece_loss(logits, labels)
    jax.block_until_ready(per_class_sce)
    jax.block_until_ready(conf_acc_diffs)

    ref_sce, ref_acc, ref_cad = _reference(logits, labels)
    assert jnp.allclose(per_class_sce, ref_sce, atol=2e-3), "per_class_sce mismatch"
    assert jnp.allclose(conf_acc_diffs, ref_cad, atol=2e-3), "conf_acc_diffs mismatch"
    assert jnp.allclose(jnp.asarray(classes_acc), jnp.asarray(ref_acc),
                        atol=2e-3), "classes_acc mismatch"
    assert len(classes_acc) == C

    print("KERNEL_OK")
</pallas_src>

<mosaic_0001>
module attributes {stable_mosaic.version = 11 : i64} {
  func.func @_stats_kernel(%arg0: i32, %arg1: memref<8x512xf32, #tpu.memory_space<vmem>>, %arg2: memref<1x512xf32, #tpu.memory_space<vmem>>, %arg3: memref<1x512xi32, #tpu.memory_space<vmem>>, %arg4: memref<1x512xf32, #tpu.memory_space<vmem>>) attributes {dimension_semantics = [#tpu.dimension_semantics<parallel>], iteration_bounds = array<i64: 2>, scalar_prefetch = 0 : i64, scratch_operands = 0 : i64, tpu.core_type = #tpu.core_type<tc>, window_params = [{transform_indices = @transform_0, window_bounds = array<i64: 8, 512>}, {transform_indices = @transform_1, window_bounds = array<i64: 1, 512>}, {transform_indices = @transform_2, window_bounds = array<i64: 1, 512>}, {transform_indices = @transform_3, window_bounds = array<i64: 1, 512>}]} {
    %c0 = arith.constant 0 : index
    %c0_0 = arith.constant 0 : index
    %0 = vector.load %arg1[%c0, %c0_0] : memref<8x512xf32, #tpu.memory_space<vmem>>, vector<8x512xf32>
    %cst = arith.constant dense<0xFF800000> : vector<512xf32>
    %1 = vector.multi_reduction <maximumf>, %0, %cst [0] : vector<8x512xf32> to vector<512xf32>
    %2 = vector.shape_cast %1 : vector<512xf32> to vector<1x512xf32>
    %3 = vector.broadcast %2 : vector<1x512xf32> to vector<8x512xf32>
    %4 = arith.subf %0, %3 : vector<8x512xf32>
    %5 = math.exp %4 : vector<8x512xf32>
    %cst_1 = arith.constant dense<0.000000e+00> : vector<512xf32>
    %6 = vector.multi_reduction <add>, %5, %cst_1 [0] : vector<8x512xf32> to vector<512xf32>
    %7 = vector.shape_cast %6 : vector<512xf32> to vector<1x512xf32>
    %8 = math.log %7 : vector<1x512xf32>
    %9 = arith.addf %2, %8 : vector<1x512xf32>
    %c0_2 = arith.constant 0 : index
    %c0_3 = arith.constant 0 : index
    %10 = vector.load %arg4[%c0_2, %c0_3] : memref<1x512xf32, #tpu.memory_space<vmem>>, vector<1x512xf32>
    tpu.vector_store %arg4[%c0_2, %c0_3], %9 {strides = array<i32>} : memref<1x512xf32, #tpu.memory_space<vmem>>, vector<1x512xf32>,
    %11 = arith.subf %2, %9 : vector<1x512xf32>
    %12 = math.exp %11 : vector<1x512xf32>
    %c0_4 = arith.constant 0 : index
    %c0_5 = arith.constant 0 : index
    %13 = vector.load %arg2[%c0_4, %c0_5] : memref<1x512xf32, #tpu.memory_space<vmem>>, vector<1x512xf32>
    tpu.vector_store %arg2[%c0_4, %c0_5], %12 {strides = array<i32>} : memref<1x512xf32, #tpu.memory_space<vmem>>, vector<1x512xf32>,
    %14 = tpu.iota {dimensions = array<i32: 0>} : vector<8x512xi32>
    %15 = vector.broadcast %2 : vector<1x512xf32> to vector<8x512xf32>
    %16 = arith.cmpf oeq, %0, %15 : vector<8x512xf32>
    %c8_i32 = arith.constant 8 : i32
    %17 = vector.broadcast %c8_i32 : i32 to vector<8x512xi32>
    %18 = arith.select %16, %14, %17 : vector<8x512xi1>, vector<8x512xi32>
    %cst_6 = arith.constant dense<2147483647> : vector<512xi32>
    %19 = vector.multi_reduction <minsi>, %18, %cst_6 [0] : vector<8x512xi32> to vector<512xi32>
    %20 = vector.shape_cast %19 : vector<512xi32> to vector<1x512xi32>
    %c0_7 = arith.constant 0 : index
    %c0_8 = arith.constant 0 : index
    %21 = vector.load %arg3[%c0_7, %c0_8] : memref<1x512xi32, #tpu.memory_space<vmem>>, vector<1x512xi32>
    tpu.vector_store %arg3[%c0_7, %c0_8], %20 {strides = array<i32>} : memref<1x512xi32, #tpu.memory_space<vmem>>, vector<1x512xi32>,
    return
  }
  func.func @transform_0(%arg0: i32) -> (i32, i32) {
    %c0_i32 = arith.constant 0 : i32
    %c0_i32_0 = arith.constant 0 : i32
    return %c0_i32, %arg0 : i32, i32
  }
  func.func @transform_1(%arg0: i32) -> (i32, i32) {
    %c0_i32 = arith.constant 0 : i32
    %c0_i32_0 = arith.constant 0 : i32
    return %c0_i32, %arg0 : i32, i32
  }
  func.func @transform_2(%arg0: i32) -> (i32, i32) {
    %c0_i32 = arith.constant 0 : i32
    %c0_i32_0 = arith.constant 0 : i32
    return %c0_i32, %arg0 : i32, i32
  }
  func.func @transform_3(%arg0: i32) -> (i32, i32) {
    %c0_i32 = arith.constant 0 : i32
    %c0_i32_0 = arith.constant 0 : i32
    return %c0_i32, %arg0 : i32, i32
  }
}

module attributes {stable_mosaic.version = 11 : i64} {
  func.func @_class_ece_kernel(%arg0: i32, %arg1: i32, %arg2: memref<8x512xf32, #tpu.memory_space<vmem>>, %arg3: memref<1x512xf32, #tpu.memory_space<vmem>>, %arg4: memref<1x512xi32, #tpu.memory_space<vmem>>, %arg5: memref<1x512xi32, #tpu.memory_space<vmem>>, %arg6: memref<16xf32, #tpu.memory_space<smem>>, %arg7: memref<8x3xf32, #tpu.memory_space<vmem>>, %arg8: memref<24x15xf32, #tpu.memory_space<vmem>>, %arg9: memref<16x1xf32, #tpu.memory_space<vmem>>) attributes {dimension_semantics = [#tpu.dimension_semantics<parallel>, #tpu.dimension_semantics<arbitrary>], iteration_bounds = array<i64: 1, 2>, scalar_prefetch = 0 : i64, scratch_operands = 2 : i64, tpu.core_type = #tpu.core_type<tc>, window_params = [{transform_indices = @transform_0, window_bounds = array<i64: 8, 512>}, {transform_indices = @transform_1, window_bounds = array<i64: 1, 512>}, {transform_indices = @transform_2, window_bounds = array<i64: 1, 512>}, {transform_indices = @transform_3, window_bounds = array<i64: 1, 512>}, {transform_indices = @transform_4, window_bounds = array<i64: 16>}, {transform_indices = @transform_5, window_bounds = array<i64: 8, 3>}]} {
    %c0 = arith.constant 0 : index
    %c0_0 = arith.constant 0 : index
    %0 = vector.load %arg2[%c0, %c0_0] : memref<8x512xf32, #tpu.memory_space<vmem>>, vector<8x512xf32>
    %c0_1 = arith.constant 0 : index
    %c0_2 = arith.constant 0 : index
    %1 = vector.load %arg3[%c0_1, %c0_2] : memref<1x512xf32, #tpu.memory_space<vmem>>, vector<1x512xf32>
    %c0_3 = arith.constant 0 : index
    %c0_4 = arith.constant 0 : index
    %2 = vector.load %arg4[%c0_3, %c0_4] : memref<1x512xi32, #tpu.memory_space<vmem>>, vector<1x512xi32>
    %c0_5 = arith.constant 0 : index
    %c0_6 = arith.constant 0 : index
    %3 = vector.load %arg5[%c0_5, %c0_6] : memref<1x512xi32, #tpu.memory_space<vmem>>, vector<1x512xi32>
    %4 = vector.broadcast %1 : vector<1x512xf32> to vector<8x512xf32>
    %5 = arith.subf %0, %4 : vector<8x512xf32>
    %6 = math.exp %5 : vector<8x512xf32>
    %c8_i32 = arith.constant 8 : i32
    %7 = arith.muli %arg0, %c8_i32 : i32
    %8 = tpu.iota {dimensions = array<i32: 0>} : vector<8x1xi32>
    %9 = vector.broadcast %7 : i32 to vector<8x1xi32>
    %10 = arith.addi %9, %8 : vector<8x1xi32>
    %11 = vector.broadcast %2 : vector<1x512xi32> to vector<8x512xi32>
    %12 = vector.broadcast %10 : vector<8x1xi32> to vector<8x512xi32>
    %13 = arith.cmpi eq, %11, %12 : vector<8x512xi32>
    %14 = arith.extui %13 : vector<8x512xi1> to vector<8x512xi32>
    %15 = arith.sitofp %14 : vector<8x512xi32> to vector<8x512xf32>
    %16 = vector.broadcast %3 : vector<1x512xi32> to vector<8x512xi32>
    %17 = vector.broadcast %10 : vector<8x1xi32> to vector<8x512xi32>
    %18 = arith.cmpi eq, %16, %17 : vector<8x512xi32>
    %19 = arith.extui %18 : vector<8x512xi1> to vector<8x512xi32>
    %20 = arith.sitofp %19 : vector<8x512xi32> to vector<8x512xf32>
    %c512_i32 = arith.constant 512 : i32
    %21 = arith.muli %arg1, %c512_i32 : i32
    %22 = tpu.iota {dimensions = array<i32: 1>} : vector<1x512xi32>
    %23 = vector.broadcast %21 : i32 to vector<1x512xi32>
    %24 = arith.addi %23, %22 : vector<1x512xi32>
    %c640_i32 = arith.constant 640 : i32
    %25 = vector.broadcast %c640_i32 : i32 to vector<1x512xi32>
    %26 = arith.cmpi slt, %24, %25 : vector<1x512xi32>
    %27 = arith.extui %26 : vector<1x512xi1> to vector<1x512xi32>
    %28 = arith.sitofp %27 : vector<1x512xi32> to vector<1x512xf32>
    %c0_i32 = arith.constant 0 : i32
    %29 = arith.cmpi eq, %arg1, %c0_i32 : i32
    %30 = arith.extui %29 : i1 to i32
    %c0_i32_7 = arith.constant 0 : i32
    %31 = arith.cmpi ne, %30, %c0_i32_7 : i32
    scf.if %31 {
      %cst_82 = arith.constant 0.000000e+00 : f32
      %424 = vector.broadcast %cst_82 : f32 to vector<24x15xf32>
      %c0_83 = arith.constant 0 : index
      %c0_84 = arith.constant 0 : index
      %425 = vector.load %arg8[%c0_83, %c0_84] : memref<24x15xf32, #tpu.memory_space<vmem>>, vector<24x15xf32>
      tpu.vector_store %arg8[%c0_83, %c0_84], %424 {strides = array<i32>} : memref<24x15xf32, #tpu.memory_space<vmem>>, vector<24x15xf32>,
      %cst_85 = arith.constant 0.000000e+00 : f32
      %426 = vector.broadcast %cst_85 : f32 to vector<16x1xf32>
      %c0_86 = arith.constant 0 : index
      %c0_87 = arith.constant 0 : index
      %427 = vector.load %arg9[%c0_86, %c0_87] : memref<16x1xf32, #tpu.memory_space<vmem>>, vector<16x1xf32>
      tpu.vector_store %arg9[%c0_86, %c0_87], %426 {strides = array<i32>} : memref<16x1xf32, #tpu.memory_space<vmem>>, vector<16x1xf32>,
    } else {
    }
    %c0_8 = arith.constant 0 : index
    %c0_9 = arith.constant 0 : index
    %32 = vector.load %arg9[%c0_8, %c0_9] : memref<16x1xf32, #tpu.memory_space<vmem>>, vector<16x1xf32>
    %cst = arith.constant dense<0.000000e+00> : vector<8xf32>
    %33 = vector.multi_reduction <add>, %15, %cst [1] : vector<8x512xf32> to vector<8xf32>
    %34 = vector.shape_cast %33 : vector<8xf32> to vector<8x1xf32>
    %35 = arith.mulf %15, %20 : vector<8x512xf32>
    %cst_10 = arith.constant dense<0.000000e+00> : vector<8xf32>
    %36 = vector.multi_reduction <add>, %35, %cst_10 [1] : vector<8x512xf32> to vector<8xf32>
    %37 = vector.shape_cast %36 : vector<8xf32> to vector<8x1xf32>
    %38 = tpu.concatenate %34, %37 in 0 : vector<8x1xf32>, vector<8x1xf32> -> vector<16x1xf32>
    %39 = arith.addf %32, %38 : vector<16x1xf32>
    %c0_11 = arith.constant 0 : index
    %c0_12 = arith.constant 0 : index
    %40 = vector.load %arg9[%c0_11, %c0_12] : memref<16x1xf32, #tpu.memory_space<vmem>>, vector<16x1xf32>
    tpu.vector_store %arg9[%c0_11, %c0_12], %39 {strides = array<i32>} : memref<16x1xf32, #tpu.memory_space<vmem>>, vector<16x1xf32>,
    %41 = tpu.iota {dimensions = array<i32: 1>} : vector<1x15xi32>
    %cst_13 = arith.constant 0.000000e+00 : f32
    %42 = vector.broadcast %cst_13 : f32 to vector<24x15xf32>
    %c0_14 = arith.constant 0 : index
    %43 = memref.load %arg6[%c0_14] : memref<16xf32, #tpu.memory_space<smem>>
    %c1 = arith.constant 1 : index
    %44 = memref.load %arg6[%c1] : memref<16xf32, #tpu.memory_space<smem>>
    %45 = vector.broadcast %43 : f32 to vector<8x512xf32>
    %46 = arith.cmpf ogt, %6, %45 : vector<8x512xf32>
    %47 = vector.broadcast %44 : f32 to vector<8x512xf32>
    %48 = arith.cmpf ole, %6, %47 : vector<8x512xf32>
    %49 = arith.andi %46, %48 : vector<8x512xi1>
    %cst_15 = arith.constant 0.000000e+00 : f32
    %50 = vector.shape_cast %28 : vector<1x512xf32> to vector<1x512xf32>
    %51 = vector.broadcast %50 : vector<1x512xf32> to vector<8x512xf32>
    %52 = vector.broadcast %cst_15 : f32 to vector<8x512xf32>
    %53 = arith.select %49, %51, %52 : vector<8x512xi1>, vector<8x512xf32>
    %54 = arith.mulf %6, %53 : vector<8x512xf32>
    %55 = arith.mulf %15, %53 : vector<8x512xf32>
    %56 = tpu.concatenate %53, %54, %55 in 0 : vector<8x512xf32>, vector<8x512xf32>, vector<8x512xf32> -> vector<24x512xf32>
    %cst_16 = arith.constant dense<0.000000e+00> : vector<24xf32>
    %57 = vector.multi_reduction <add>, %56, %cst_16 [1] : vector<24x512xf32> to vector<24xf32>
    %58 = vector.shape_cast %57 : vector<24xf32> to vector<24x1xf32>
    %c0_i32_17 = arith.constant 0 : i32
    %59 = vector.broadcast %c0_i32_17 : i32 to vector<1x15xi32>
    %60 = arith.cmpi eq, %41, %59 : vector<1x15xi32>
    %cst_18 = arith.constant 0.000000e+00 : f32
    %61 = vector.shape_cast %60 : vector<1x15xi1> to vector<1x15xi1>
    %62 = vector.broadcast %61 : vector<1x15xi1> to vector<24x15xi1>
    %63 = vector.shape_cast %58 : vector<24x1xf32> to vector<24x1xf32>
    %64 = vector.broadcast %63 : vector<24x1xf32> to vector<24x15xf32>
    %65 = vector.broadcast %cst_18 : f32 to vector<24x15xf32>
    %66 = arith.select %62, %64, %65 : vector<24x15xi1>, vector<24x15xf32>
    %67 = arith.addf %42, %66 : vector<24x15xf32>
    %c1_19 = arith.constant 1 : index
    %68 = memref.load %arg6[%c1_19] : memref<16xf32, #tpu.memory_space<smem>>
    %c2 = arith.constant 2 : index
    %69 = memref.load %arg6[%c2] : memref<16xf32, #tpu.memory_space<smem>>
    %70 = vector.broadcast %68 : f32 to vector<8x512xf32>
    %71 = arith.cmpf ogt, %6, %70 : vector<8x512xf32>
    %72 = vector.broadcast %69 : f32 to vector<8x512xf32>
    %73 = arith.cmpf ole, %6, %72 : vector<8x512xf32>
    %74 = arith.andi %71, %73 : vector<8x512xi1>
    %cst_20 = arith.constant 0.000000e+00 : f32
    %75 = vector.shape_cast %28 : vector<1x512xf32> to vector<1x512xf32>
    %76 = vector.broadcast %75 : vector<1x512xf32> to vector<8x512xf32>
    %77 = vector.broadcast %cst_20 : f32 to vector<8x512xf32>
    %78 = arith.select %74, %76, %77 : vector<8x512xi1>, vector<8x512xf32>
    %79 = arith.mulf %6, %78 : vector<8x512xf32>
    %80 = arith.mulf %15, %78 : vector<8x512xf32>
    %81 = tpu.concatenate %78, %79, %80 in 0 : vector<8x512xf32>, vector<8x512xf32>, vector<8x512xf32> -> vector<24x512xf32>
    %cst_21 = arith.constant dense<0.000000e+00> : vector<24xf32>
    %82 = vector.multi_reduction <add>, %81, %cst_21 [1] : vector<24x512xf32> to vector<24xf32>
    %83 = vector.shape_cast %82 : vector<24xf32> to vector<24x1xf32>
    %c1_i32 = arith.constant 1 : i32
    %84 = vector.broadcast %c1_i32 : i32 to vector<1x15xi32>
    %85 = arith.cmpi eq, %41, %84 : vector<1x15xi32>
    %cst_22 = arith.constant 0.000000e+00 : f32
    %86 = vector.shape_cast %85 : vector<1x15xi1> to vector<1x15xi1>
    %87 = vector.broadcast %86 : vector<1x15xi1> to vector<24x15xi1>
    %88 = vector.shape_cast %83 : vector<24x1xf32> to vector<24x1xf32>
    %89 = vector.broadcast %88 : vector<24x1xf32> to vector<24x15xf32>
    %90 = vector.broadcast %cst_22 : f32 to vector<24x15xf32>
    %91 = arith.select %87, %89, %90 : vector<24x15xi1>, vector<24x15xf32>
    %92 = arith.addf %67, %91 : vector<24x15xf32>
    %c2_23 = arith.constant 2 : index
    %93 = memref.load %arg6[%c2_23] : memref<16xf32, #tpu.memory_space<smem>>
    %c3 = arith.constant 3 : index
    %94 = memref.load %arg6[%c3] : memref<16xf32, #tpu.memory_space<smem>>
    %95 = vector.broadcast %93 : f32 to vector<8x512xf32>
    %96 = arith.cmpf ogt, %6, %95 : vector<8x512xf32>
    %97 = vector.broadcast %94 : f32 to vector<8x512xf32>
    %98 = arith.cmpf ole, %6, %97 : vector<8x512xf32>
    %99 = arith.andi %96, %98 : vector<8x512xi1>
    %cst_24 = arith.constant 0.000000e+00 : f32
    %100 = vector.shape_cast %28 : vector<1x512xf32> to vector<1x512xf32>
    %101 = vector.broadcast %100 : vector<1x512xf32> to vector<8x512xf32>
    %102 = vector.broadcast %cst_24 : f32 to vector<8x512xf32>
    %103 = arith.select %99, %101, %102 : vector<8x512xi1>, vector<8x512xf32>
    %104 = arith.mulf %6, %103 : vector<8x512xf32>
    %105 = arith.mulf %15, %103 : vector<8x512xf32>
    %106 = tpu.concatenate %103, %104, %105 in 0 : vector<8x512xf32>, vector<8x512xf32>, vector<8x512xf32> -> vector<24x512xf32>
    %cst_25 = arith.constant dense<0.000000e+00> : vector<24xf32>
    %107 = vector.multi_reduction <add>, %106, %cst_25 [1] : vector<24x512xf32> to vector<24xf32>
    %108 = vector.shape_cast %107 : vector<24xf32> to vector<24x1xf32>
    %c2_i32 = arith.constant 2 : i32
    %109 = vector.broadcast %c2_i32 : i32 to vector<1x15xi32>
    %110 = arith.cmpi eq, %41, %109 : vector<1x15xi32>
    %cst_26 = arith.constant 0.000000e+00 : f32
    %111 = vector.shape_cast %110 : vector<1x15xi1> to vector<1x15xi1>
    %112 = vector.broadcast %111 : vector<1x15xi1> to vector<24x15xi1>
    %113 = vector.shape_cast %108 : vector<24x1xf32> to vector<24x1xf32>
    %114 = vector.broadcast %113 : vector<24x1xf32> to vector<24x15xf32>
    %115 = vector.broadcast %cst_26 : f32 to vector<24x15xf32>
    %116 = arith.select %112, %114, %115 : vector<24x15xi1>, vector<24x15xf32>
    %117 = arith.addf %92, %116 : vector<24x15xf32>
    %c3_27 = arith.constant 3 : index
    %118 = memref.load %arg6[%c3_27] : memref<16xf32, #tpu.memory_space<smem>>
    %c4 = arith.constant 4 : index
    %119 = memref.load %arg6[%c4] : memref<16xf32, #tpu.memory_space<smem>>
    %120 = vector.broadcast %118 : f32 to vector<8x512xf32>
    %121 = arith.cmpf ogt, %6, %120 : vector<8x512xf32>
    %122 = vector.broadcast %119 : f32 to vector<8x512xf32>
    %123 = arith.cmpf ole, %6, %122 : vector<8x512xf32>
    %124 = arith.andi %121, %123 : vector<8x512xi1>
    %cst_28 = arith.constant 0.000000e+00 : f32
    %125 = vector.shape_cast %28 : vector<1x512xf32> to vector<1x512xf32>
    %126 = vector.broadcast %125 : vector<1x512xf32> to vector<8x512xf32>
    %127 = vector.broadcast %cst_28 : f32 to vector<8x512xf32>
    %128 = arith.select %124, %126, %127 : vector<8x512xi1>, vector<8x512xf32>
    %129 = arith.mulf %6, %128 : vector<8x512xf32>
    %130 = arith.mulf %15, %128 : vector<8x512xf32>
    %131 = tpu.concatenate %128, %129, %130 in 0 : vector<8x512xf32>, vector<8x512xf32>, vector<8x512xf32> -> vector<24x512xf32>
    %cst_29 = arith.constant dense<0.000000e+00> : vector<24xf32>
    %132 = vector.multi_reduction <add>, %131, %cst_29 [1] : vector<24x512xf32> to vector<24xf32>
    %133 = vector.shape_cast %132 : vector<24xf32> to vector<24x1xf32>
    %c3_i32 = arith.constant 3 : i32
    %134 = vector.broadcast %c3_i32 : i32 to vector<1x15xi32>
    %135 = arith.cmpi eq, %41, %134 : vector<1x15xi32>
    %cst_30 = arith.constant 0.000000e+00 : f32
    %136 = vector.shape_cast %135 : vector<1x15xi1> to vector<1x15xi1>
    %137 = vector.broadcast %136 : vector<1x15xi1> to vector<24x15xi1>
    %138 = vector.shape_cast %133 : vector<24x1xf32> to vector<24x1xf32>
    %139 = vector.broadcast %138 : vector<24x1xf32> to vector<24x15xf32>
    %140 = vector.broadcast %cst_30 : f32 to vector<24x15xf32>
    %141 = arith.select %137, %139, %140 : vector<24x15xi1>, vector<24x15xf32>
    %142 = arith.addf %117, %141 : vector<24x15xf32>
    %c4_31 = arith.constant 4 : index
    %143 = memref.load %arg6[%c4_31] : memref<16xf32, #tpu.memory_space<smem>>
    %c5 = arith.constant 5 : index
    %144 = memref.load %arg6[%c5] : memref<16xf32, #tpu.memory_space<smem>>
    %145 = vector.broadcast %143 : f32 to vector<8x512xf32>
    %146 = arith.cmpf ogt, %6, %145 : vector<8x512xf32>
    %147 = vector.broadcast %144 : f32 to vector<8x512xf32>
    %148 = arith.cmpf ole, %6, %147 : vector<8x512xf32>
    %149 = arith.andi %146, %148 : vector<8x512xi1>
    %cst_32 = arith.constant 0.000000e+00 : f32
    %150 = vector.shape_cast %28 : vector<1x512xf32> to vector<1x512xf32>
    %151 = vector.broadcast %150 : vector<1x512xf32> to vector<8x512xf32>
    %152 = vector.broadcast %cst_32 : f32 to vector<8x512xf32>
    %153 = arith.select %149, %151, %152 : vector<8x512xi1>, vector<8x512xf32>
    %154 = arith.mulf %6, %153 : vector<8x512xf32>
    %155 = arith.mulf %15, %153 : vector<8x512xf32>
    %156 = tpu.concatenate %153, %154, %155 in 0 : vector<8x512xf32>, vector<8x512xf32>, vector<8x512xf32> -> vector<24x512xf32>
    %cst_33 = arith.constant dense<0.000000e+00> : vector<24xf32>
    %157 = vector.multi_reduction <add>, %156, %cst_33 [1] : vector<24x512xf32> to vector<24xf32>
    %158 = vector.shape_cast %157 : vector<24xf32> to vector<24x1xf32>
    %c4_i32 = arith.constant 4 : i32
    %159 = vector.broadcast %c4_i32 : i32 to vector<1x15xi32>
    %160 = arith.cmpi eq, %41, %159 : vector<1x15xi32>
    %cst_34 = arith.constant 0.000000e+00 : f32
    %161 = vector.shape_cast %160 : vector<1x15xi1> to vector<1x15xi1>
    %162 = vector.broadcast %161 : vector<1x15xi1> to vector<24x15xi1>
    %163 = vector.shape_cast %158 : vector<24x1xf32> to vector<24x1xf32>
    %164 = vector.broadcast %163 : vector<24x1xf32> to vector<24x15xf32>
    %165 = vector.broadcast %cst_34 : f32 to vector<24x15xf32>
    %166 = arith.select %162, %164, %165 : vector<24x15xi1>, vector<24x15xf32>
    %167 = arith.addf %142, %166 : vector<24x15xf32>
    %c5_35 = arith.constant 5 : index
    %168 = memref.load %arg6[%c5_35] : memref<16xf32, #tpu.memory_space<smem>>
    %c6 = arith.constant 6 : index
    %169 = memref.load %arg6[%c6] : memref<16xf32, #tpu.memory_space<smem>>
    %170 = vector.broadcast %168 : f32 to vector<8x512xf32>
    %171 = arith.cmpf ogt, %6, %170 : vector<8x512xf32>
    %172 = vector.broadcast %169 : f32 to vector<8x512xf32>
    %173 = arith.cmpf ole, %6, %172 : vector<8x512xf32>
    %174 = arith.andi %171, %173 : vector<8x512xi1>
    %cst_36 = arith.constant 0.000000e+00 : f32
    %175 = vector.shape_cast %28 : vector<1x512xf32> to vector<1x512xf32>
    %176 = vector.broadcast %175 : vector<1x512xf32> to vector<8x512xf32>
    %177 = vector.broadcast %cst_36 : f32 to vector<8x512xf32>
    %178 = arith.select %174, %176, %177 : vector<8x512xi1>, vector<8x512xf32>
    %179 = arith.mulf %6, %178 : vector<8x512xf32>
    %180 = arith.mulf %15, %178 : vector<8x512xf32>
    %181 = tpu.concatenate %178, %179, %180 in 0 : vector<8x512xf32>, vector<8x512xf32>, vector<8x512xf32> -> vector<24x512xf32>
    %cst_37 = arith.constant dense<0.000000e+00> : vector<24xf32>
    %182 = vector.multi_reduction <add>, %181, %cst_37 [1] : vector<24x512xf32> to vector<24xf32>
    %183 = vector.shape_cast %182 : vector<24xf32> to vector<24x1xf32>
    %c5_i32 = arith.constant 5 : i32
    %184 = vector.broadcast %c5_i32 : i32 to vector<1x15xi32>
    %185 = arith.cmpi eq, %41, %184 : vector<1x15xi32>
    %cst_38 = arith.constant 0.000000e+00 : f32
    %186 = vector.shape_cast %185 : vector<1x15xi1> to vector<1x15xi1>
    %187 = vector.broadcast %186 : vector<1x15xi1> to vector<24x15xi1>
    %188 = vector.shape_cast %183 : vector<24x1xf32> to vector<24x1xf32>
    %189 = vector.broadcast %188 : vector<24x1xf32> to vector<24x15xf32>
    %190 = vector.broadcast %cst_38 : f32 to vector<24x15xf32>
    %191 = arith.select %187, %189, %190 : vector<24x15xi1>, vector<24x15xf32>
    %192 = arith.addf %167, %191 : vector<24x15xf32>
    %c6_39 = arith.constant 6 : index
    %193 = memref.load %arg6[%c6_39] : memref<16xf32, #tpu.memory_space<smem>>
    %c7 = arith.constant 7 : index
    %194 = memref.load %arg6[%c7] : memref<16xf32, #tpu.memory_space<smem>>
    %195 = vector.broadcast %193 : f32 to vector<8x512xf32>
    %196 = arith.cmpf ogt, %6, %195 : vector<8x512xf32>
    %197 = vector.broadcast %194 : f32 to vector<8x512xf32>
    %198 = arith.cmpf ole, %6, %197 : vector<8x512xf32>
    %199 = arith.andi %196, %198 : vector<8x512xi1>
    %cst_40 = arith.constant 0.000000e+00 : f32
    %200 = vector.shape_cast %28 : vector<1x512xf32> to vector<1x512xf32>
    %201 = vector.broadcast %200 : vector<1x512xf32> to vector<8x512xf32>
    %202 = vector.broadcast %cst_40 : f32 to vector<8x512xf32>
    %203 = arith.select %199, %201, %202 : vector<8x512xi1>, vector<8x512xf32>
    %204 = arith.mulf %6, %203 : vector<8x512xf32>
    %205 = arith.mulf %15, %203 : vector<8x512xf32>
    %206 = tpu.concatenate %203, %204, %205 in 0 : vector<8x512xf32>, vector<8x512xf32>, vector<8x512xf32> -> vector<24x512xf32>
    %cst_41 = arith.constant dense<0.000000e+00> : vector<24xf32>
    %207 = vector.multi_reduction <add>, %206, %cst_41 [1] : vector<24x512xf32> to vector<24xf32>
    %208 = vector.shape_cast %207 : vector<24xf32> to vector<24x1xf32>
    %c6_i32 = arith.constant 6 : i32
    %209 = vector.broadcast %c6_i32 : i32 to vector<1x15xi32>
    %210 = arith.cmpi eq, %41, %209 : vector<1x15xi32>
    %cst_42 = arith.constant 0.000000e+00 : f32
    %211 = vector.shape_cast %210 : vector<1x15xi1> to vector<1x15xi1>
    %212 = vector.broadcast %211 : vector<1x15xi1> to vector<24x15xi1>
    %213 = vector.shape_cast %208 : vector<24x1xf32> to vector<24x1xf32>
    %214 = vector.broadcast %213 : vector<24x1xf32> to vector<24x15xf32>
    %215 = vector.broadcast %cst_42 : f32 to vector<24x15xf32>
    %216 = arith.select %212, %214, %215 : vector<24x15xi1>, vector<24x15xf32>
    %217 = arith.addf %192, %216 : vector<24x15xf32>
    %c7_43 = arith.constant 7 : index
    %218 = memref.load %arg6[%c7_43] : memref<16xf32, #tpu.memory_space<smem>>
    %c8 = arith.constant 8 : index
    %219 = memref.load %arg6[%c8] : memref<16xf32, #tpu.memory_space<smem>>
    %220 = vector.broadcast %218 : f32 to vector<8x512xf32>
    %221 = arith.cmpf ogt, %6, %220 : vector<8x512xf32>
    %222 = vector.broadcast %219 : f32 to vector<8x512xf32>
    %223 = arith.cmpf ole, %6, %222 : vector<8x512xf32>
    %224 = arith.andi %221, %223 : vector<8x512xi1>
    %cst_44 = arith.constant 0.000000e+00 : f32
    %225 = vector.shape_cast %28 : vector<1x512xf32> to vector<1x512xf32>
    %226 = vector.broadcast %225 : vector<1x512xf32> to vector<8x512xf32>
    %227 = vector.broadcast %cst_44 : f32 to vector<8x512xf32>
    %228 = arith.select %224, %226, %227 : vector<8x512xi1>, vector<8x512xf32>
    %229 = arith.mulf %6, %228 : vector<8x512xf32>
    %230 = arith.mulf %15, %228 : vector<8x512xf32>
    %231 = tpu.concatenate %228, %229, %230 in 0 : vector<8x512xf32>, vector<8x512xf32>, vector<8x512xf32> -> vector<24x512xf32>
    %cst_45 = arith.constant dense<0.000000e+00> : vector<24xf32>
    %232 = vector.multi_reduction <add>, %231, %cst_45 [1] : vector<24x512xf32> to vector<24xf32>
    %233 = vector.shape_cast %232 : vector<24xf32> to vector<24x1xf32>
    %c7_i32 = arith.constant 7 : i32
    %234 = vector.broadcast %c7_i32 : i32 to vector<1x15xi32>
    %235 = arith.cmpi eq, %41, %234 : vector<1x15xi32>
    %cst_46 = arith.constant 0.000000e+00 : f32
    %236 = vector.shape_cast %235 : vector<1x15xi1> to vector<1x15xi1>
    %237 = vector.broadcast %236 : vector<1x15xi1> to vector<24x15xi1>
    %238 = vector.shape_cast %233 : vector<24x1xf32> to vector<24x1xf32>
    %239 = vector.broadcast %238 : vector<24x1xf32> to vector<24x15xf32>
    %240 = vector.broadcast %cst_46 : f32 to vector<24x15xf32>
    %241 = arith.select %237, %239, %240 : vector<24x15xi1>, vector<24x15xf32>
    %242 = arith.addf %217, %241 : vector<24x15xf32>
    %c8_47 = arith.constant 8 : index
    %243 = memref.load %arg6[%c8_47] : memref<16xf32, #tpu.memory_space<smem>>
    %c9 = arith.constant 9 : index
    %244 = memref.load %arg6[%c9] : memref<16xf32, #tpu.memory_space<smem>>
    %245 = vector.broadcast %243 : f32 to vector<8x512xf32>
    %246 = arith.cmpf ogt, %6, %245 : vector<8x512xf32>
    %247 = vector.broadcast %244 : f32 to vector<8x512xf32>
    %248 = arith.cmpf ole, %6, %247 : vector<8x512xf32>
    %249 = arith.andi %246, %248 : vector<8x512xi1>
    %cst_48 = arith.constant 0.000000e+00 : f32
    %250 = vector.shape_cast %28 : vector<1x512xf32> to vector<1x512xf32>
    %251 = vector.broadcast %250 : vector<1x512xf32> to vector<8x512xf32>
    %252 = vector.broadcast %cst_48 : f32 to vector<8x512xf32>
    %253 = arith.select %249, %251, %252 : vector<8x512xi1>, vector<8x512xf32>
    %254 = arith.mulf %6, %253 : vector<8x512xf32>
    %255 = arith.mulf %15, %253 : vector<8x512xf32>
    %256 = tpu.concatenate %253, %254, %255 in 0 : vector<8x512xf32>, vector<8x512xf32>, vector<8x512xf32> -> vector<24x512xf32>
    %cst_49 = arith.constant dense<0.000000e+00> : vector<24xf32>
    %257 = vector.multi_reduction <add>, %256, %cst_49 [1] : vector<24x512xf32> to vector<24xf32>
    %258 = vector.shape_cast %257 : vector<24xf32> to vector<24x1xf32>
    %c8_i32_50 = arith.constant 8 : i32
    %259 = vector.broadcast %c8_i32_50 : i32 to vector<1x15xi32>
    %260 = arith.cmpi eq, %41, %259 : vector<1x15xi32>
    %cst_51 = arith.constant 0.000000e+00 : f32
    %261 = vector.shape_cast %260 : vector<1x15xi1> to vector<1x15xi1>
    %262 = vector.broadcast %261 : vector<1x15xi1> to vector<24x15xi1>
    %263 = vector.shape_cast %258 : vector<24x1xf32> to vector<24x1xf32>
    %264 = vector.broadcast %263 : vector<24x1xf32> to vector<24x15xf32>
    %265 = vector.broadcast %cst_51 : f32 to vector<24x15xf32>
    %266 = arith.select %262, %264, %265 : vector<24x15xi1>, vector<24x15xf32>
    %267 = arith.addf %242, %266 : vector<24x15xf32>
    %c9_52 = arith.constant 9 : index
    %268 = memref.load %arg6[%c9_52] : memref<16xf32, #tpu.memory_space<smem>>
    %c10 = arith.constant 10 : index
    %269 = memref.load %arg6[%c10] : memref<16xf32, #tpu.memory_space<smem>>
    %270 = vector.broadcast %268 : f32 to vector<8x512xf32>
    %271 = arith.cmpf ogt, %6, %270 : vector<8x512xf32>
    %272 = vector.broadcast %269 : f32 to vector<8x512xf32>
    %273 = arith.cmpf ole, %6, %272 : vector<8x512xf32>
    %274 = arith.andi %271, %273 : vector<8x512xi1>
    %cst_53 = arith.constant 0.000000e+00 : f32
    %275 = vector.shape_cast %28 : vector<1x512xf32> to vector<1x512xf32>
    %276 = vector.broadcast %275 : vector<1x512xf32> to vector<8x512xf32>
    %277 = vector.broadcast %cst_53 : f32 to vector<8x512xf32>
    %278 = arith.select %274, %276, %277 : vector<8x512xi1>, vector<8x512xf32>
    %279 = arith.mulf %6, %278 : vector<8x512xf32>
    %280 = arith.mulf %15, %278 : vector<8x512xf32>
    %281 = tpu.concatenate %278, %279, %280 in 0 : vector<8x512xf32>, vector<8x512xf32>, vector<8x512xf32> -> vector<24x512xf32>
    %cst_54 = arith.constant dense<0.000000e+00> : vector<24xf32>
    %282 = vector.multi_reduction <add>, %281, %cst_54 [1] : vector<24x512xf32> to vector<24xf32>
    %283 = vector.shape_cast %282 : vector<24xf32> to vector<24x1xf32>
    %c9_i32 = arith.constant 9 : i32
    %284 = vector.broadcast %c9_i32 : i32 to vector<1x15xi32>
    %285 = arith.cmpi eq, %41, %284 : vector<1x15xi32>
    %cst_55 = arith.constant 0.000000e+00 : f32
    %286 = vector.shape_cast %285 : vector<1x15xi1> to vector<1x15xi1>
    %287 = vector.broadcast %286 : vector<1x15xi1> to vector<24x15xi1>
    %288 = vector.shape_cast %283 : vector<24x1xf32> to vector<24x1xf32>
    %289 = vector.broadcast %288 : vector<24x1xf32> to vector<24x15xf32>
    %290 = vector.broadcast %cst_55 : f32 to vector<24x15xf32>
    %291 = arith.select %287, %289, %290 : vector<24x15xi1>, vector<24x15xf32>
    %292 = arith.addf %267, %291 : vector<24x15xf32>
    %c10_56 = arith.constant 10 : index
    %293 = memref.load %arg6[%c10_56] : memref<16xf32, #tpu.memory_space<smem>>
    %c11 = arith.constant 11 : index
    %294 = memref.load %arg6[%c11] : memref<16xf32, #tpu.memory_space<smem>>
    %295 = vector.broadcast %293 : f32 to vector<8x512xf32>
    %296 = arith.cmpf ogt, %6, %295 : vector<8x512xf32>
    %297 = vector.broadcast %294 : f32 to vector<8x512xf32>
    %298 = arith.cmpf ole, %6, %297 : vector<8x512xf32>
    %299 = arith.andi %296, %298 : vector<8x512xi1>
    %cst_57 = arith.constant 0.000000e+00 : f32
    %300 = vector.shape_cast %28 : vector<1x512xf32> to vector<1x512xf32>
    %301 = vector.broadcast %300 : vector<1x512xf32> to vector<8x512xf32>
    %302 = vector.broadcast %cst_57 : f32 to vector<8x512xf32>
    %303 = arith.select %299, %301, %302 : vector<8x512xi1>, vector<8x512xf32>
    %304 = arith.mulf %6, %303 : vector<8x512xf32>
    %305 = arith.mulf %15, %303 : vector<8x512xf32>
    %306 = tpu.concatenate %303, %304, %305 in 0 : vector<8x512xf32>, vector<8x512xf32>, vector<8x512xf32> -> vector<24x512xf32>
    %cst_58 = arith.constant dense<0.000000e+00> : vector<24xf32>
    %307 = vector.multi_reduction <add>, %306, %cst_58 [1] : vector<24x512xf32> to vector<24xf32>
    %308 = vector.shape_cast %307 : vector<24xf32> to vector<24x1xf32>
    %c10_i32 = arith.constant 10 : i32
    %309 = vector.broadcast %c10_i32 : i32 to vector<1x15xi32>
    %310 = arith.cmpi eq, %41, %309 : vector<1x15xi32>
    %cst_59 = arith.constant 0.000000e+00 : f32
    %311 = vector.shape_cast %310 : vector<1x15xi1> to vector<1x15xi1>
    %312 = vector.broadcast %311 : vector<1x15xi1> to vector<24x15xi1>
    %313 = vector.shape_cast %308 : vector<24x1xf32> to vector<24x1xf32>
    %314 = vector.broadcast %313 : vector<24x1xf32> to vector<24x15xf32>
    %315 = vector.broadcast %cst_59 : f32 to vector<24x15xf32>
    %316 = arith.select %312, %314, %315 : vector<24x15xi1>, vector<24x15xf32>
    %317 = arith.addf %292, %316 : vector<24x15xf32>
    %c11_60 = arith.constant 11 : index
    %318 = memref.load %arg6[%c11_60] : memref<16xf32, #tpu.memory_space<smem>>
    %c12 = arith.constant 12 : index
    %319 = memref.load %arg6[%c12] : memref<16xf32, #tpu.memory_space<smem>>
    %320 = vector.broadcast %318 : f32 to vector<8x512xf32>
    %321 = arith.cmpf ogt, %6, %320 : vector<8x512xf32>
    %322 = vector.broadcast %319 : f32 to vector<8x512xf32>
    %323 = arith.cmpf ole, %6, %322 : vector<8x512xf32>
    %324 = arith.andi %321, %323 : vector<8x512xi1>
    %cst_61 = arith.constant 0.000000e+00 : f32
    %325 = vector.shape_cast %28 : vector<1x512xf32> to vector<1x512xf32>
    %326 = vector.broadcast %325 : vector<1x512xf32> to vector<8x512xf32>
    %327 = vector.broadcast %cst_61 : f32 to vector<8x512xf32>
    %328 = arith.select %324, %326, %327 : vector<8x512xi1>, vector<8x512xf32>
    %329 = arith.mulf %6, %328 : vector<8x512xf32>
    %330 = arith.mulf %15, %328 : vector<8x512xf32>
    %331 = tpu.concatenate %328, %329, %330 in 0 : vector<8x512xf32>, vector<8x512xf32>, vector<8x512xf32> -> vector<24x512xf32>
    %cst_62 = arith.constant dense<0.000000e+00> : vector<24xf32>
    %332 = vector.multi_reduction <add>, %331, %cst_62 [1] : vector<24x512xf32> to vector<24xf32>
    %333 = vector.shape_cast %332 : vector<24xf32> to vector<24x1xf32>
    %c11_i32 = arith.constant 11 : i32
    %334 = vector.broadcast %c11_i32 : i32 to vector<1x15xi32>
    %335 = arith.cmpi eq, %41, %334 : vector<1x15xi32>
    %cst_63 = arith.constant 0.000000e+00 : f32
    %336 = vector.shape_cast %335 : vector<1x15xi1> to vector<1x15xi1>
    %337 = vector.broadcast %336 : vector<1x15xi1> to vector<24x15xi1>
    %338 = vector.shape_cast %333 : vector<24x1xf32> to vector<24x1xf32>
    %339 = vector.broadcast %338 : vector<24x1xf32> to vector<24x15xf32>
    %340 = vector.broadcast %cst_63 : f32 to vector<24x15xf32>
    %341 = arith.select %337, %339, %340 : vector<24x15xi1>, vector<24x15xf32>
    %342 = arith.addf %317, %341 : vector<24x15xf32>
    %c12_64 = arith.constant 12 : index
    %343 = memref.load %arg6[%c12_64] : memref<16xf32, #tpu.memory_space<smem>>
    %c13 = arith.constant 13 : index
    %344 = memref.load %arg6[%c13] : memref<16xf32, #tpu.memory_space<smem>>
    %345 = vector.broadcast %343 : f32 to vector<8x512xf32>
    %346 = arith.cmpf ogt, %6, %345 : vector<8x512xf32>
    %347 = vector.broadcast %344 : f32 to vector<8x512xf32>
    %348 = arith.cmpf ole, %6, %347 : vector<8x512xf32>
    %349 = arith.andi %346, %348 : vector<8x512xi1>
    %cst_65 = arith.constant 0.000000e+00 : f32
    %350 = vector.shape_cast %28 : vector<1x512xf32> to vector<1x512xf32>
    %351 = vector.broadcast %350 : vector<1x512xf32> to vector<8x512xf32>
    %352 = vector.broadcast %cst_65 : f32 to vector<8x512xf32>
    %353 = arith.select %349, %351, %352 : vector<8x512xi1>, vector<8x512xf32>
    %354 = arith.mulf %6, %353 : vector<8x512xf32>
    %355 = arith.mulf %15, %353 : vector<8x512xf32>
    %356 = tpu.concatenate %353, %354, %355 in 0 : vector<8x512xf32>, vector<8x512xf32>, vector<8x512xf32> -> vector<24x512xf32>
    %cst_66 = arith.constant dense<0.000000e+00> : vector<24xf32>
    %357 = vector.multi_reduction <add>, %356, %cst_66 [1] : vector<24x512xf32> to vector<24xf32>
    %358 = vector.shape_cast %357 : vector<24xf32> to vector<24x1xf32>
    %c12_i32 = arith.constant 12 : i32
    %359 = vector.broadcast %c12_i32 : i32 to vector<1x15xi32>
    %360 = arith.cmpi eq, %41, %359 : vector<1x15xi32>
    %cst_67 = arith.constant 0.000000e+00 : f32
    %361 = vector.shape_cast %360 : vector<1x15xi1> to vector<1x15xi1>
    %362 = vector.broadcast %361 : vector<1x15xi1> to vector<24x15xi1>
    %363 = vector.shape_cast %358 : vector<24x1xf32> to vector<24x1xf32>
    %364 = vector.broadcast %363 : vector<24x1xf32> to vector<24x15xf32>
    %365 = vector.broadcast %cst_67 : f32 to vector<24x15xf32>
    %366 = arith.select %362, %364, %365 : vector<24x15xi1>, vector<24x15xf32>
    %367 = arith.addf %342, %366 : vector<24x15xf32>
    %c13_68 = arith.constant 13 : index
    %368 = memref.load %arg6[%c13_68] : memref<16xf32, #tpu.memory_space<smem>>
    %c14 = arith.constant 14 : index
    %369 = memref.load %arg6[%c14] : memref<16xf32, #tpu.memory_space<smem>>
    %370 = vector.broadcast %368 : f32 to vector<8x512xf32>
    %371 = arith.cmpf ogt, %6, %370 : vector<8x512xf32>
    %372 = vector.broadcast %369 : f32 to vector<8x512xf32>
    %373 = arith.cmpf ole, %6, %372 : vector<8x512xf32>
    %374 = arith.andi %371, %373 : vector<8x512xi1>
    %cst_69 = arith.constant 0.000000e+00 : f32
    %375 = vector.shape_cast %28 : vector<1x512xf32> to vector<1x512xf32>
    %376 = vector.broadcast %375 : vector<1x512xf32> to vector<8x512xf32>
    %377 = vector.broadcast %cst_69 : f32 to vector<8x512xf32>
    %378 = arith.select %374, %376, %377 : vector<8x512xi1>, vector<8x512xf32>
    %379 = arith.mulf %6, %378 : vector<8x512xf32>
    %380 = arith.mulf %15, %378 : vector<8x512xf32>
    %381 = tpu.concatenate %378, %379, %380 in 0 : vector<8x512xf32>, vector<8x512xf32>, vector<8x512xf32> -> vector<24x512xf32>
    %cst_70 = arith.constant dense<0.000000e+00> : vector<24xf32>
    %382 = vector.multi_reduction <add>, %381, %cst_70 [1] : vector<24x512xf32> to vector<24xf32>
    %383 = vector.shape_cast %382 : vector<24xf32> to vector<24x1xf32>
    %c13_i32 = arith.constant 13 : i32
    %384 = vector.broadcast %c13_i32 : i32 to vector<1x15xi32>
    %385 = arith.cmpi eq, %41, %384 : vector<1x15xi32>
    %cst_71 = arith.constant 0.000000e+00 : f32
    %386 = vector.shape_cast %385 : vector<1x15xi1> to vector<1x15xi1>
    %387 = vector.broadcast %386 : vector<1x15xi1> to vector<24x15xi1>
    %388 = vector.shape_cast %383 : vector<24x1xf32> to vector<24x1xf32>
    %389 = vector.broadcast %388 : vector<24x1xf32> to vector<24x15xf32>
    %390 = vector.broadcast %cst_71 : f32 to vector<24x15xf32>
    %391 = arith.select %387, %389, %390 : vector<24x15xi1>, vector<24x15xf32>
    %392 = arith.addf %367, %391 : vector<24x15xf32>
    %c14_72 = arith.constant 14 : index
    %393 = memref.load %arg6[%c14_72] : memref<16xf32, #tpu.memory_space<smem>>
    %c15 = arith.constant 15 : index
    %394 = memref.load %arg6[%c15] : memref<16xf32, #tpu.memory_space<smem>>
    %395 = vector.broadcast %393 : f32 to vector<8x512xf32>
    %396 = arith.cmpf ogt, %6, %395 : vector<8x512xf32>
    %397 = vector.broadcast %394 : f32 to vector<8x512xf32>
    %398 = arith.cmpf ole, %6, %397 : vector<8x512xf32>
    %399 = arith.andi %396, %398 : vector<8x512xi1>
    %cst_73 = arith.constant 0.000000e+00 : f32
    %400 = vector.shape_cast %28 : vector<1x512xf32> to vector<1x512xf32>
    %401 = vector.broadcast %400 : vector<1x512xf32> to vector<8x512xf32>
    %402 = vector.broadcast %cst_73 : f32 to vector<8x512xf32>
    %403 = arith.select %399, %401, %402 : vector<8x512xi1>, vector<8x512xf32>
    %404 = arith.mulf %6, %403 : vector<8x512xf32>
    %405 = arith.mulf %15, %403 : vector<8x512xf32>
    %406 = tpu.concatenate %403, %404, %405 in 0 : vector<8x512xf32>, vector<8x512xf32>, vector<8x512xf32> -> vector<24x512xf32>
    %cst_74 = arith.constant dense<0.000000e+00> : vector<24xf32>
    %407 = vector.multi_reduction <add>, %406, %cst_74 [1] : vector<24x512xf32> to vector<24xf32>
    %408 = vector.shape_cast %407 : vector<24xf32> to vector<24x1xf32>
    %c14_i32 = arith.constant 14 : i32
    %409 = vector.broadcast %c14_i32 : i32 to vector<1x15xi32>
    %410 = arith.cmpi eq, %41, %409 : vector<1x15xi32>
    %cst_75 = arith.constant 0.000000e+00 : f32
    %411 = vector.shape_cast %410 : vector<1x15xi1> to vector<1x15xi1>
    %412 = vector.broadcast %411 : vector<1x15xi1> to vector<24x15xi1>
    %413 = vector.shape_cast %408 : vector<24x1xf32> to vector<24x1xf32>
    %414 = vector.broadcast %413 : vector<24x1xf32> to vector<24x15xf32>
    %415 = vector.broadcast %cst_75 : f32 to vector<24x15xf32>
    %416 = arith.select %412, %414, %415 : vector<24x15xi1>, vector<24x15xf32>
    %417 = arith.addf %392, %416 : vector<24x15xf32>
    %c0_76 = arith.constant 0 : index
    %c0_77 = arith.constant 0 : index
    %418 = vector.load %arg8[%c0_76, %c0_77] : memref<24x15xf32, #tpu.memory_space<vmem>>, vector<24x15xf32>
    %419 = arith.addf %418, %417 : vector<24x15xf32>
    %c0_78 = arith.constant 0 : index
    %c0_79 = arith.constant 0 : index
    %420 = vector.load %arg8[%c0_78, %c0_79] : memref<24x15xf32, #tpu.memory_space<vmem>>, vector<24x15xf32>
    tpu.vector_store %arg8[%c0_78, %c0_79], %419 {strides = array<i32>} : memref<24x15xf32, #tpu.memory_space<vmem>>, vector<24x15xf32>,
    %c1_i32_80 = arith.constant 1 : i32
    %421 = arith.cmpi eq, %arg1, %c1_i32_80 : i32
    %422 = arith.extui %421 : i1 to i32
    %c0_i32_81 = arith.constant 0 : i32
    %423 = arith.cmpi ne, %422, %c0_i32_81 : i32
    scf.if %423 {
      %c0_82 = arith.constant 0 : index
      %c0_83 = arith.constant 0 : index
      %424 = vector.load %arg8[%c0_82, %c0_83] : memref<24x15xf32, #tpu.memory_space<vmem>>, vector<24x15xf32>
      %425 = vector.extract_strided_slice %424 {offsets = [0, 0], sizes = [8, 15], strides = [1, 1]} : vector<24x15xf32> to vector<8x15xf32>
      %426 = vector.extract_strided_slice %424 {offsets = [8, 0], sizes = [8, 15], strides = [1, 1]} : vector<24x15xf32> to vector<8x15xf32>
      %427 = vector.extract_strided_slice %424 {offsets = [16, 0], sizes = [8, 15], strides = [1, 1]} : vector<24x15xf32> to vector<8x15xf32>
      %cst_84 = arith.constant 0.000000e+00 : f32
      %428 = vector.broadcast %cst_84 : f32 to vector<8x15xf32>
      %429 = arith.cmpf ogt, %425, %428 : vector<8x15xf32>
      %cst_85 = arith.constant 1.000000e+00 : f32
      %430 = vector.broadcast %cst_85 : f32 to vector<8x15xf32>
      %431 = arith.select %429, %425, %430 : vector<8x15xi1>, vector<8x15xf32>
      %432 = tpu.reciprocal %431 {approx = true} : vector<8x15xf32> -> vector<8x15xf32>
      %433 = arith.subf %426, %427 : vector<8x15xf32>
      %434 = arith.mulf %433, %432 : vector<8x15xf32>
      %cst_86 = arith.constant 0.000000e+00 : f32
      %435 = vector.broadcast %cst_86 : f32 to vector<8x15xf32>
      %436 = arith.select %429, %434, %435 : vector<8x15xi1>, vector<8x15xf32>
      %cst_87 = arith.constant 1.562500e-03 : f32
      %437 = vector.broadcast %cst_87 : f32 to vector<8x15xf32>
      %438 = arith.mulf %425, %437 : vector<8x15xf32>
      %439 = math.absf %436 : vector<8x15xf32>
      %440 = arith.mulf %439, %438 : vector<8x15xf32>
      %cst_88 = arith.constant dense<0.000000e+00> : vector<8xf32>
      %441 = vector.multi_reduction <add>, %440, %cst_88 [1] : vector<8x15xf32> to vector<8xf32>
      %442 = vector.shape_cast %441 : vector<8xf32> to vector<8x1xf32>
      %443 = arith.mulf %436, %438 : vector<8x15xf32>
      %cst_89 = arith.constant dense<0.000000e+00> : vector<8xf32>
      %444 = vector.multi_reduction <add>, %443, %cst_89 [1] : vector<8x15xf32> to vector<8xf32>
      %445 = vector.shape_cast %444 : vector<8xf32> to vector<8x1xf32>
      %c0_90 = arith.constant 0 : index
      %c0_91 = arith.constant 0 : index
      %446 = vector.load %arg9[%c0_90, %c0_91] : memref<16x1xf32, #tpu.memory_space<vmem>>, vector<16x1xf32>
      %447 = vector.extract_strided_slice %446 {offsets = [0, 0], sizes = [8, 1], strides = [1, 1]} : vector<16x1xf32> to vector<8x1xf32>
      %448 = vector.extract_strided_slice %446 {offsets = [8, 0], sizes = [8, 1], strides = [1, 1]} : vector<16x1xf32> to vector<8x1xf32>
      %cst_92 = arith.constant 0.000000e+00 : f32
      %449 = vector.broadcast %cst_92 : f32 to vector<8x1xf32>
      %450 = arith.cmpf ogt, %447, %449 : vector<8x1xf32>
      %cst_93 = arith.constant 1.000000e+00 : f32
      %451 = vector.broadcast %cst_93 : f32 to vector<8x1xf32>
      %452 = arith.select %450, %447, %451 : vector<8x1xi1>, vector<8x1xf32>
      %453 = tpu.reciprocal %452 {approx = true} : vector<8x1xf32> -> vector<8x1xf32>
      %454 = arith.mulf %448, %453 : vector<8x1xf32>
      %cst_94 = arith.constant 0.000000e+00 : f32
      %455 = vector.broadcast %cst_94 : f32 to vector<8x1xf32>
      %456 = arith.select %450, %454, %455 : vector<8x1xi1>, vector<8x1xf32>
      %457 = tpu.iota {dimensions = array<i32: 1>} : vector<1x3xi32>
      %c0_i32_95 = arith.constant 0 : i32
      %458 = vector.broadcast %c0_i32_95 : i32 to vector<1x3xi32>
      %459 = arith.cmpi eq, %457, %458 : vector<1x3xi32>
      %c1_i32_96 = arith.constant 1 : i32
      %460 = vector.broadcast %c1_i32_96 : i32 to vector<1x3xi32>
      %461 = arith.cmpi eq, %457, %460 : vector<1x3xi32>
      %462 = vector.shape_cast %461 : vector<1x3xi1> to vector<1x3xi1>
      %463 = vector.broadcast %462 : vector<1x3xi1> to vector<8x3xi1>
      %464 = vector.shape_cast %445 : vector<8x1xf32> to vector<8x1xf32>
      %465 = vector.broadcast %464 : vector<8x1xf32> to vector<8x3xf32>
      %466 = vector.shape_cast %456 : vector<8x1xf32> to vector<8x1xf32>
      %467 = vector.broadcast %466 : vector<8x1xf32> to vector<8x3xf32>
      %468 = arith.select %463, %465, %467 : vector<8x3xi1>, vector<8x3xf32>
      %469 = vector.shape_cast %459 : vector<1x3xi1> to vector<1x3xi1>
      %470 = vector.broadcast %469 : vector<1x3xi1> to vector<8x3xi1>
      %471 = vector.shape_cast %442 : vector<8x1xf32> to vector<8x1xf32>
      %472 = vector.broadcast %471 : vector<8x1xf32> to vector<8x3xf32>
      %473 = arith.select %470, %472, %468 : vector<8x3xi1>, vector<8x3xf32>
      %c0_97 = arith.constant 0 : index
      %c0_98 = arith.constant 0 : index
      %474 = vector.load %arg7[%c0_97, %c0_98] : memref<8x3xf32, #tpu.memory_space<vmem>>, vector<8x3xf32>
      tpu.vector_store %arg7[%c0_97, %c0_98], %473 {strides = array<i32>} : memref<8x3xf32, #tpu.memory_space<vmem>>, vector<8x3xf32>,
    } else {
    }
    return
  }
  func.func @transform_0(%arg0: i32, %arg1: i32) -> (i32, i32) {
    %c0_i32 = arith.constant 0 : i32
    return %arg0, %arg1 : i32, i32
  }
  func.func @transform_1(%arg0: i32, %arg1: i32) -> (i32, i32) {
    %c0_i32 = arith.constant 0 : i32
    %c0_i32_0 = arith.constant 0 : i32
    return %c0_i32, %arg1 : i32, i32
  }
  func.func @transform_2(%arg0: i32, %arg1: i32) -> (i32, i32) {
    %c0_i32 = arith.constant 0 : i32
    %c0_i32_0 = arith.constant 0 : i32
    return %c0_i32, %arg1 : i32, i32
  }
  func.func @transform_3(%arg0: i32, %arg1: i32) -> (i32, i32) {
    %c0_i32 = arith.constant 0 : i32
    %c0_i32_0 = arith.constant 0 : i32
    return %c0_i32, %arg1 : i32, i32
  }
  func.func @transform_4(%arg0: i32, %arg1: i32) -> i32 {
    %c0_i32 = arith.constant 0 : i32
    %c0_i32_0 = arith.constant 0 : i32
    return %c0_i32 : i32
  }
  func.func @transform_5(%arg0: i32, %arg1: i32) -> (i32, i32) {
    %c0_i32 = arith.constant 0 : i32
    %c0_i32_0 = arith.constant 0 : i32
    return %arg0, %c0_i32 : i32, i32
  }
}

</mosaic_0001>

<bundles_post_ra>
// kernel: custom-call
= control target key start
LH: loop header
LB: loop body
LE: loop exit
PB: predicated region body
PF: predicated region fallthrough
CT: control target
= control target key end

     0   :  { %s6_s0 = inlined_call_operand.vmem [shape: u32[16], index: 0, kind: output, shape index: {}]  }

// kernel: _class_ece_device.2
= control target key start
LH: loop header
LB: loop body
LE: loop exit
PB: predicated region body
PF: predicated region fallthrough
CT: control target
= control target key end

     0   :  { %s598_s12 = smov 0   ;;  %s674_s0 = inlined_call_operand.vmem [shape: f32[8,1024], index: 0, kind: input, shape index: {}]   ;;  %s675_s1 = inlined_call_operand.vmem [shape: f32[1,1024], index: 1, kind: output, shape index: {0}]   ;;  %s676_s2 = inlined_call_operand.vmem [shape: s32[1,1024], index: 2, kind: output, shape index: {1}]   ;;  %s677_s3 = inlined_call_operand.vmem [shape: f32[1,1024], index: 3, kind: output, shape index: {2}]  }
   0x1 LB: > { %s524_s13 = sadd.s32 4294967295, %s575_s12   ;;  %p528_p0 = scmp.ge.s32.totalorder %s575_s12, 1  ;;  %s575_s12 = sphi %s598_s12, %s14_s12  }
   0x2   : > { %p143_p1 = scmp.lt.s32.totalorder %s575_s12, 3 }
   0x4   : > { %p144_p2 = pnand %p528_p0, %p143_p1 }
   0x5   : > { %s529_s14 = sshll.u32 (!%p144_p2), %s524_s13, 2  ;;  %v280_v20 = vlaneseq (!%p144_p2)  ;;  %v577_v46 = vmov (!%p144_p2), 1966171168  }
   0x6   : > { %147 = sbr.rel (%p144_p2) target bundleno = 98 (0x62), region = 24  ;;  %p175_p3 = scmp.lt.s32.totalorder (!%p144_p2), %s529_s14, 7  ;;  %v278_v47 = vunpack.c.l.s4 (!%p144_p2), %v577_v46 }
   0x7   : > { %v281_v29 = vshrl.u32 (!%p144_p2), %v280_v20, 7 }
   0x8   : > { %v279_v55 = vunpack.c.0.s8 (!%p144_p2), %v278_v47 }
   0xd   : > { %s681_s14 = smov (!%p175_p3, %s529_s14), 7 }
   0xe   : > { %s530_s15 = sshll.u32 %s681_s14, 3  ;;  %s188_s21 = scalar_lea.vmem %s676_s2, %s681_s14 }
   0xf   : > { %s178_s18 = scalar_lea.vmem %s674_s0, %s530_s15  ;;  %s193_s24 = scalar_lea.vmem %s677_s3, %s681_s14 }
  0x10   : > { %v195_v0 = vld [vmem:[%s178_s18] sm:$0xff]  ;;  %v196_v1 = vld [vmem:[%s178_s18 + $0x8] sm:$0xff]  ;;  %v197_v2 = vld [vmem:[%s178_s18 + $0x10] sm:$0xff]  ;;  %s183_s27 = scalar_lea.vmem %s675_s1, %s681_s14 }
  0x11   : > { %v198_v3 = vld [vmem:[%s178_s18 + $0x18] sm:$0xff]  ;;  %v199_v4 = vrot.slane %v195_v0, 4  ;;  %v205_v5 = vrot.slane %v196_v1, 4  ;;  %v211_v6 = vrot.slane %v197_v2, 4 }
  0x12   : > { %v217_v7 = vrot.slane %v198_v3, 4 }
  0x13   : > { %v200_v8 = vmax.f32 %v195_v0, %v199_v4  ;;  %v206_v9 = vmax.f32 %v196_v1, %v205_v5  ;;  %v212_v10 = vmax.f32 %v197_v2, %v211_v6 }
  0x14   : > { %v218_v11 = vmax.f32 %v198_v3, %v217_v7 }
  0x15   : > { %v201_v12 = vrot.slane %v200_v8, 2  ;;  %v207_v13 = vrot.slane %v206_v9, 2  ;;  %v213_v14 = vrot.slane %v212_v10, 2 }
  0x16   : > { %v219_v15 = vrot.slane %v218_v11, 2 }
  0x17   : > { %v202_v16 = vmax.f32 %v200_v8, %v201_v12  ;;  %v208_v17 = vmax.f32 %v206_v9, %v207_v13  ;;  %v214_v18 = vmax.f32 %v212_v10, %v213_v14 }
  0x18   : > { %v220_v19 = vmax.f32 %v218_v11, %v219_v15 }
  0x19   : > { %v203_v21 = vrot.slane %v202_v16, 1  ;;  %v209_v22 = vrot.slane %v208_v17, 1  ;;  %v215_v23 = vrot.slane %v214_v18, 1 }
  0x1a   : > { %v221_v24 = vrot.slane %v220_v19, 1 }
  0x1b   : > { %v612_v25 = vmax.f32 %v202_v16, %v203_v21  ;;  %v614_v26 = vmax.f32 %v208_v17, %v209_v22  ;;  %v616_v27 = vmax.f32 %v214_v18, %v215_v23 }
  0x1c   : > { %v618_v28 = vmax.f32 %v220_v19, %v221_v24 }
  0x1d   : > { %v223_v30 = vsub.f32 %v195_v0, %v612_v25  ;;  %v224_v31 = vsub.f32 %v196_v1, %v614_v26  ;;  %v225_v32 = vsub.f32 %v197_v2, %v616_v27  ;;  %vm349_vm0 = vcmp.eq.f32.partialorder %v195_v0, %v612_v25 }
  0x1e   : > { %v226_v33 = vsub.f32 %v198_v3, %v618_v28  ;;  %vm350_vm1 = vcmp.eq.f32.partialorder %v196_v1, %v614_v26  ;;  %vm351_vm2 = vcmp.eq.f32.partialorder %v197_v2, %v616_v27  ;;  %vm352_vm3 = vcmp.eq.f32.partialorder %v198_v3, %v618_v28 }
  0x1f   : > { %v227_v34 = vmul.f32 1.442695, %v223_v30  ;;  %v229_v35 = vmul.f32 1.442695, %v224_v31  ;;  %v231_v36 = vmul.f32 1.442695, %v225_v32  ;;  %v629_v1 = vsub.s32 %v279_v55, %v281_v29 }
  0x20   : > { %v233_v37 = vmul.f32 1.442695, %v226_v33  ;;  %v353_v38 = vsel %vm349_vm0, %v281_v29, 8  ;;  %v354_v39 = vsel %vm350_vm1, %v281_v29, 8  ;;  %v355_v40 = vsel %vm351_vm2, %v281_v29, 8 }
  0x21   : > { %545 = vpow2.f32 %v227_v34  ;;  %v356_v41 = vsel %vm352_vm3, %v281_v29, 8  ;;  %v357_v42 = vrot.slane %v353_v38, 4  ;;  %v366_v43 = vrot.slane %v354_v39, 4 }
  0x22   : > { %547 = vpow2.f32 %v229_v35  ;;  %v375_v44 = vrot.slane %v355_v40, 4  ;;  %v384_v45 = vrot.slane %v356_v41, 4  ;;  %vm634_vm0 = vcmp.lt.s32.totalorder %v280_v20, 512 }
  0x23   : > { %549 = vpow2.f32 %v231_v36  ;;  %vm358_vm4 = vcmp.lt.s32.totalorder %v353_v38, %v357_v42  ;;  %vm367_vm5 = vcmp.lt.s32.totalorder %v354_v39, %v366_v43 }
  0x24   : > { %551 = vpow2.f32 %v233_v37  ;;  %v359_v48 = vsel %vm358_vm4, %v353_v38, %v357_v42  ;;  %v368_v49 = vsel %vm367_vm5, %v354_v39, %v366_v43  ;;  %vm376_vm6 = vcmp.lt.s32.totalorder %v355_v40, %v375_v44 }
  0x25   : > { %v360_v50 = vrot.slane %v359_v48, 2  ;;  %v369_v51 = vrot.slane %v368_v49, 2  ;;  %v377_v52 = vsel %vm376_vm6, %v355_v40, %v375_v44  ;;  %vm385_vm7 = vcmp.lt.s32.totalorder %v356_v41, %v384_v45 }
  0x26   : > { %v378_v53 = vrot.slane %v377_v52, 2  ;;  %v386_v54 = vsel %vm385_vm7, %v356_v41, %v384_v45 }
  0x27   : > { %vm361_vm8 = vcmp.lt.s32.totalorder %v359_v48, %v360_v50  ;;  %vm370_vm9 = vcmp.lt.s32.totalorder %v368_v49, %v369_v51  ;;  %v387_v56 = vrot.slane %v386_v54, 2 }
  0x28   : > { %v362_v57 = vsel %vm361_vm8, %v359_v48, %v360_v50  ;;  %v371_v58 = vsel %vm370_vm9, %v368_v49, %v369_v51  ;;  %vm379_vm10 = vcmp.lt.s32.totalorder %v377_v52, %v378_v53 }
  0x29   : > { %v363_v59 = vrot.slane %v362_v57, 1  ;;  %v372_v60 = vrot.slane %v371_v58, 1  ;;  %v380_v61 = vsel %vm379_vm10, %v377_v52, %v378_v53  ;;  %vm388_vm11 = vcmp.lt.s32.totalorder %v386_v54, %v387_v56 }
  0x2a   : > { %v381_v62 = vrot.slane %v380_v61, 1  ;;  %v389_v63 = vsel %vm388_vm11, %v386_v54, %v387_v56 }
  0x2b   : > { %v546_v0 = vpop.eup %545  ;;  %vm364_vm12 = vcmp.lt.s32.totalorder %v362_v57, %v363_v59  ;;  %vm373_vm13 = vcmp.lt.s32.totalorder %v371_v58, %v372_v60  ;;  %v390_v2 = vrot.slane %v389_v63, 1 }
  0x2c   : > { %v548_v3 = vpop.eup %547  ;;  %v235_v4 = vrot.slane %v546_v0, 4  ;;  %v365_v5 = vsel %vm364_vm12, %v362_v57, %v363_v59  ;;  %v374_v6 = vsel %vm373_vm13, %v371_v58, %v372_v60  ;;  %vm382_vm14 = vcmp.lt.s32.totalorder %v380_v61, %v381_v62 }
  0x2d   : > { %v550_v7 = vpop.eup %549  ;;  %v241_v8 = vrot.slane %v548_v3, 4  ;;  %v383_v9 = vsel %vm382_vm14, %v380_v61, %v381_v62  ;;  %vm391_vm15 = vcmp.lt.s32.totalorder %v389_v63, %v390_v2  ;;  %v393_v10 = vcombine.low %v365_v5, %v374_v6 }
  0x2e   : > { %v552_v11 = vpop.eup %551  ;;  %v236_v12 = vadd.f32 %v546_v0, %v235_v4  ;;  %v247_v13 = vrot.slane %v550_v7, 4  ;;  %v392_v14 = vsel %vm391_vm15, %v389_v63, %v390_v2 }
  0x2f   : > { %v242_v15 = vadd.f32 %v548_v3, %v241_v8  ;;  %v253_v16 = vrot.slane %v552_v11, 4  ;;  %v394_v17 = vcombine.low %v383_v9, %v392_v14  ;;  %v401_v18 = vrot.slane %v393_v10, %v629_v1 }
  0x30   : > { %v237_v19 = vrot.slane %v236_v12, 2  ;;  %v248_v21 = vadd.f32 %v550_v7, %v247_v13 }
  0x31   : > { %v243_v22 = vrot.slane %v242_v15, 2  ;;  %v254_v23 = vadd.f32 %v552_v11, %v253_v16  ;;  %v408_v24 = vrot.slane %v394_v17, %v629_v1 }
  0x32   : > { %v238_v29 = vadd.f32 %v237_v19, %v236_v12  ;;  %v249_v30 = vrot.slane %v248_v21, 2 }
  0x33   : > { %v244_v31 = vadd.f32 %v243_v22, %v242_v15  ;;  %v255_v32 = vrot.slane %v254_v23, 2  ;;  %v409_v33 = vcombine.low %v401_v18, %v408_v24 }
  0x34   : > { %v239_v34 = vrot.slane %v238_v29, 1  ;;  %v250_v35 = vadd.f32 %v249_v30, %v248_v21 }
  0x35   : > { %v245_v37 = vrot.slane %v244_v31, 1  ;;  %v256_v38 = vadd.f32 %v255_v32, %v254_v23  ;;  %v416_v39 = vrot.slane %v409_v33, %v629_v1 }
  0x36   : > { %v240_v40 = vadd.f32 %v239_v34, %v238_v29  ;;  %v251_v41 = vrot.slane %v250_v35, 1 }
  0x37   : > { %v246_v42 = vadd.f32 %v245_v37, %v244_v31  ;;  %v257_v43 = vrot.slane %v256_v38, 1  ;;  %417 = vst.msk [vmem:[%s188_s21] sm:$0xf] %vm634_vm0, %v416_v39 }
  0x38   : > { %v252_v44 = vadd.f32 %v251_v41, %v250_v35  ;;  %553 = vlog2.f32 %v240_v40 }
  0x39   : > { %v258_v20 = vadd.f32 %v257_v43, %v256_v38  ;;  %555 = vlog2.f32 %v246_v42 }
  0x3a   : > { %557 = vlog2.f32 %v252_v44 }
  0x3b   : > { %559 = vlog2.f32 %v258_v20 }
  0x42   : > { %v554_v45 = vpop.eup %553 }
  0x43   : > { %v556_v46 = vpop.eup %555  ;;  %v260_v47 = vmul.f32 0.6931472, %v554_v45 }
  0x44   : > { %v558_v48 = vpop.eup %557  ;;  %v262_v49 = vmul.f32 0.6931472, %v556_v46 }
  0x45   : > { %v560_v50 = vpop.eup %559  ;;  %v264_v51 = vmul.f32 0.6931472, %v558_v48  ;;  %v267_v52 = vadd.f32 %v260_v47, %v612_v25 }
  0x46   : > { %v266_v53 = vmul.f32 0.6931472, %v560_v50  ;;  %v268_v54 = vadd.f32 %v262_v49, %v614_v26 }
  0x47   : > { %v269_v55 = vadd.f32 %v264_v51, %v616_v27  ;;  %v305_v56 = vsub.f32 %v612_v25, %v267_v52 }
  0x48   : > { %v270_v57 = vadd.f32 %v266_v53, %v618_v28  ;;  %v275_v58 = vcombine.low %v267_v52, %v268_v54  ;;  %v306_v59 = vsub.f32 %v614_v26, %v268_v54 }
  0x49   : > { %v307_v60 = vsub.f32 %v616_v27, %v269_v55  ;;  %v309_v61 = vmul.f32 1.442695, %v305_v56 }
  0x4a   : > { %v276_v62 = vcombine.low %v269_v55, %v270_v57  ;;  %v283_v63 = vrot.slane %v275_v58, %v629_v1  ;;  %v308_v0 = vsub.f32 %v618_v28, %v270_v57  ;;  %v311_v2 = vmul.f32 1.442695, %v306_v59 }
  0x4b   : > { %561 = vpow2.f32 %v309_v61  ;;  %v313_v3 = vmul.f32 1.442695, %v307_v60 }
  0x4c   : > { %v290_v4 = vrot.slane %v276_v62, %v629_v1  ;;  %563 = vpow2.f32 %v311_v2  ;;  %v315_v25 = vmul.f32 1.442695, %v308_v0 }
  0x4d   : > { %565 = vpow2.f32 %v313_v3 }
  0x4e   : > { %v291_v5 = vcombine.low %v283_v63, %v290_v4  ;;  %567 = vpow2.f32 %v315_v25 }
  0x50   : > { %v298_v26 = vrot.slane %v291_v5, %v629_v1 }
  0x52   : > { %304 = vst.msk [vmem:[%s193_s24] sm:$0xf] %vm634_vm0, %v298_v26 }
  0x55   : > { %v562_v27 = vpop.eup %561 }
  0x56   : > { %v564_v28 = vpop.eup %563 }
  0x57   : > { %v566_v6 = vpop.eup %565  ;;  %v321_v7 = vcombine.low %v562_v27, %v564_v28 }
  0x58   : > { %v568_v8 = vpop.eup %567 }
  0x59   : > { %v322_v9 = vcombine.low %v566_v6, %v568_v8  ;;  %v329_v10 = vrot.slane %v321_v7, %v629_v1 }
  0x5b   : > { %v336_v11 = vrot.slane %v322_v9, %v629_v1 }
  0x5d   : > { %v337_v12 = vcombine.low %v329_v10, %v336_v11 }
  0x5f   : > { %v344_v13 = vrot.slane %v337_v12, %v629_v1 }
  0x61   : > { %346 = vst.msk [vmem:[%s183_s27] sm:$0xf] %vm634_vm0, %v344_v13 }
  0x62 PF: > { %s14_s12 = sadd.s32 1, %s575_s12  }
  0x63   : > { %p11_p4 = scmp.ge.s32.totalorder %s14_s12, 4  }
  0x65   :  { %13 = sbr.rel (!%p11_p4) target bundleno = 1 (0x1), region = 78 }

// kernel: _class_ece_device.3
= control target key start
LH: loop header
LB: loop body
LE: loop exit
PB: predicated region body
PF: predicated region fallthrough
CT: control target
= control target key end

     0   :  { %10 = vsyncpa [#allocation5], 0  ;;  %s1556_s18 = smov 0   ;;  %s1558_s19 = smov 0   ;;  %s2516_s0 = inlined_call_operand.vmem [shape: f32[8,1024], index: 0, kind: input, shape index: {}]   ;;  %s2517_s1 = inlined_call_operand.vmem [shape: f32[1,1024], index: 1, kind: input, shape index: {}]   ;;  %s2518_s2 = inlined_call_operand.vmem [shape: s32[1,1024], index: 2, kind: input, shape index: {}]   ;;  %s2519_s3 = inlined_call_operand.vmem [shape: s32[1,1024], index: 3, kind: input, shape index: {}]   ;;  %s2520_s4 = inlined_call_operand.vmem [shape: f32[16], index: 4, kind: input, shape index: {}]   ;;  %s2521_s5 = inlined_call_operand.vmem [shape: f32[8,3], index: 5, kind: output, shape index: {}]  }
   0x1   :  { %s1560_s20 = smov 0  }
   0x2 LB: > { %s1383_s21 = sadd.s32 4294967295, %s1520_s20   ;;  %s25_s22 = sadd.s32 1, %s1516_s19  ;;  %s1520_s20 = sphi %s1560_s20, %s16_s20   ;;  %s1516_s19 = sphi %s1558_s19, %s2526_s19   ;;  %s1512_s18 = sphi %s1556_s18, %s2525_s18  }
   0x3   : > { %p26_p0 = scmp.ge.s32.totalorder %s25_s22, 2  ;;  %p1384_p1 = scmp.ge.s32.totalorder %s1520_s20, 1 }
   0x4   : > { %p186_p2 = scmp.lt.s32.totalorder %s1520_s20, 3  ;;  %p1581_p4 = scmp.eq.s32.totalorder %s1383_s21, 0 }
   0x5   : > { %s2528_s22 = smov (%p26_p0, %s25_s22), 0  ;;  %s199_s27 = sshll.u32 %s2520_s4, 4  ;;  %s200_s27 = int_to_ptr.vmem [resolvable:$true] %s199_s27 }
   0x6   : > { %p1577_p3 = pnand %p1384_p1, %p186_p2  ;;  %s1479_s28 = scalar_lea.vmem %s200_s27, 16 }
   0x7   : > { %p1480_p7 = scmp.ne.s32.totalorder %s200_s27, %s1479_s28  ;;  %p1487_p11 = scmp.lt.s32.totalorder %s200_s27, %s200_s27 }
   0x8   : > { %p1431_p5 = pneg %p1577_p3  ;;  %p1488_p12 = scmp.lt.s32.totalorder %s1479_s28, %s1479_s28 }
   0xa   : > { %p1432_p6 = pnand %p1581_p4, %p1431_p5  ;;  %p1489_p13 = por %p1488_p12, %p1487_p11 }
   0xc   : > { %p1481_p8 = pneg %p1432_p6 }
   0xe   : > { %p1482_p9 = pnand %p1481_p8, %p1480_p7 }
  0x10   : > { %p1483_p10 = pneg %p1482_p9 }
  0x12   : > { %p1490_p0 = pnand %p1489_p13, %p1483_p10 }
  0x14   : > { %1493 = shalt.err (!%p1490_p0)
}
  0x15   : > { %s1522_s29 = smov [#allocation4]   ;;  %249 = sbr.rel (%p1577_p3) target bundleno = 501 (0x1f5), region = 40 }
  0x16   : > { %1434 = dma.vmem_to_smem (!%p1432_p6), %s200_s27, 16, %s1522_s29, [#allocation5]  }
  0x1c   : > { %1507 = dma.done.wait (%p1581_p4), [#allocation5], 16  }
  0x1d   : > { %1509 = vsyncadd (%p1581_p4), [#allocation5], 4294967280 }
  0x1e   : > { %255 = sfence }
  0x1f   : > { %s1389_s30 = sshll.u32 %s1512_s18, 2  ;;  %v330_v0 = vlaneseq  ;;  %s1402_s6 = sshll.u32 %s1512_s18, 9  ;;  %v1523_v39 = vmov 0.0  }
  0x20   : > { %p296_p1 = scmp.lt.s32.totalorder %s1389_s30, 7  ;;  %v429_v3 = vstv %s1402_s6  ;;  %p1407_p2 = scmp.ne.s32.totalorder %s1512_s18, 0 }
  0x21   : > { %v1600_v1 = vshrl.u32 %v330_v0, 7  ;;  %v1602_v2 = vand.u32 127, %v330_v0  ;;  %vm450_vm12 = vcmask (!%p1407_p2), 121856   ;;  %vm454_vm13 = vcmask (!%p1407_p2), 7168  }
  0x22   : > { %s2530_s30 = smov (!%p296_p1, %s1389_s30), 7  ;;  %v1524_v59 = vmov (!%p1407_p2), 0.0  }
  0x23   : > { %v332_v4 = vsub.s32 0, %v1600_v1  ;;  %v336_v5 = vsub.s32 1, %v1600_v1  ;;  %v340_v6 = vsub.s32 2, %v1600_v1  ;;  %v344_v7 = vsub.s32 3, %v1600_v1  ;;  %s1390_s7 = sshll.u32 %s2530_s30, 3  ;;  %s306_s10 = scalar_lea.vmem %s2517_s1, %s2530_s30  ;;  %451 = vst.msk [vmem:[#allocation2] sm:$0xff] (!%p1407_p2), %vm450_vm12, %v1524_v59 }
  0x24   : > { %v426_v8 = vadd.s32 128, %v1602_v2  ;;  %v427_v9 = vadd.s32 256, %v1602_v2  ;;  %v428_v10 = vadd.s32 384, %v1602_v2  ;;  %v430_v11 = vadd.s32 %v429_v3, %v1602_v2  ;;  %s301_s13 = scalar_lea.vmem %s2516_s0, %s1390_s7  ;;  %s311_s16 = scalar_lea.vmem %s2518_s2, %s2530_s30  ;;  %v326_v12 = vld [vmem:[%s306_s10] sm:$0xf]  ;;  %452 = vst.msk [vmem:[#allocation2 + $0x8] sm:$0xff] (!%p1407_p2), %vm450_vm12, %v1524_v59 }
  0x25   : > { %s316_s23 = scalar_lea.vmem %s2519_s3, %s2530_s30  ;;  %v322_v13 = vld [vmem:[%s301_s13] sm:$0xff]  ;;  %v323_v14 = vld [vmem:[%s301_s13 + $0x8] sm:$0xff]  ;;  %v324_v15 = vld [vmem:[%s301_s13 + $0x10] sm:$0xff]  ;;  %v333_v16 = vrot.slane %v326_v12, %v332_v4  ;;  %v337_v17 = vrot.slane %v326_v12, %v336_v5  ;;  %v341_v18 = vrot.slane %v326_v12, %v340_v6  ;;  %v345_v19 = vrot.slane %v326_v12, %v344_v7  ;;  %453 = vst.msk [vmem:[#allocation2 + $0x10] sm:$0xff] (!%p1407_p2), %vm450_vm12, %v1524_v59 }
  0x26   : > { %v325_v20 = vld [vmem:[%s301_s13 + $0x18] sm:$0xff]  ;;  %v327_v21 = vld [vmem:[%s311_s16] sm:$0xf]  ;;  %v431_v23 = vadd.s32 %v429_v3, %v426_v8  ;;  %v432_v24 = vadd.s32 %v429_v3, %v427_v9  ;;  %v433_v25 = vadd.s32 %v429_v3, %v428_v10  ;;  %vm434_vm0 = vcmp.lt.s32.totalorder %v430_v11, 640  ;;  %455 = vst.msk [vmem:[#allocation3] sm:$0xff] (!%p1407_p2), %vm454_vm13, %v1524_v59  ;;  %456 = vst.msk [vmem:[#allocation3 + $0x8] sm:$0xff] (!%p1407_p2), %vm454_vm13, %v1524_v59 }
  0x27   : > { %v328_v22 = vld [vmem:[%s316_s23] sm:$0xf]  ;;  %v350_v26 = vsub.f32 %v322_v13, %v333_v16  ;;  %v351_v27 = vsub.f32 %v323_v14, %v337_v17  ;;  %v352_v28 = vsub.f32 %v324_v15, %v341_v18  ;;  %v353_v29 = vsub.f32 %v325_v20, %v345_v19 }
  0x28   : > { %v370_v30 = vrot.slane %v327_v21, %v332_v4  ;;  %v374_v31 = vrot.slane %v327_v21, %v336_v5  ;;  %v378_v32 = vrot.slane %v327_v21, %v340_v6  ;;  %v382_v33 = vrot.slane %v327_v21, %v344_v7 }
  0x29   : > { %v354_v34 = vmul.f32 1.442695, %v350_v26  ;;  %v356_v35 = vmul.f32 1.442695, %v351_v27  ;;  %v358_v36 = vmul.f32 1.442695, %v352_v28  ;;  %v398_v37 = vrot.slane %v328_v22, %v332_v4 }
  0x2a   : > { %v360_v38 = vmul.f32 1.442695, %v353_v29  ;;  %vm383_vm1 = vcmp.eq.s32.totalorder %v370_v30, %v1600_v1  ;;  %vm384_vm2 = vcmp.eq.s32.totalorder %v374_v31, %v1600_v1  ;;  %vm385_vm3 = vcmp.eq.s32.totalorder %v378_v32, %v1600_v1 }
  0x2b   : > { %1465 = vpow2.f32 %v354_v34  ;;  %vm386_vm4 = vcmp.eq.s32.totalorder %v382_v33, %v1600_v1  ;;  %v1628_v40 = vsel %vm383_vm1, 1.0, %v1523_v39  ;;  %v1630_v41 = vsel %vm384_vm2, 1.0, %v1523_v39 }
  0x2c   : > { %1467 = vpow2.f32 %v356_v35  ;;  %v1632_v42 = vsel %vm385_vm3, 1.0, %v1523_v39  ;;  %v1634_v43 = vsel %vm386_vm4, 1.0, %v1523_v39  ;;  %v402_v44 = vrot.slane %v328_v22, %v336_v5 }
  0x2d   : > { %1469 = vpow2.f32 %v358_v36  ;;  %v406_v45 = vrot.slane %v328_v22, %v340_v6  ;;  %v410_v46 = vrot.slane %v328_v22, %v344_v7  ;;  %vm411_vm5 = vcmp.eq.s32.totalorder %v398_v37, %v1600_v1 }
  0x2e   : > { %1471 = vpow2.f32 %v360_v38  ;;  %vm412_vm6 = vcmp.eq.s32.totalorder %v402_v44, %v1600_v1  ;;  %v1638_v47 = vsel %vm411_vm5, 1.0, %v1523_v39  ;;  %vm435_vm7 = vcmp.lt.s32.totalorder %v431_v23, 640 }
  0x2f   : > { %vm413_vm8 = vcmp.eq.s32.totalorder %v406_v45, %v1600_v1  ;;  %vm414_vm9 = vcmp.eq.s32.totalorder %v410_v46, %v1600_v1  ;;  %v1642_v48 = vsel %vm412_vm6, 1.0, %v1523_v39  ;;  %vm436_vm10 = vcmp.lt.s32.totalorder %v432_v24, 640 }
  0x30   : > { %v1644_v49 = vsel %vm413_vm8, 1.0, %v1523_v39  ;;  %v1646_v50 = vsel %vm414_vm9, 1.0, %v1523_v39  ;;  %vm437_vm11 = vcmp.lt.s32.totalorder %v433_v25, 640  ;;  %v1649_v51 = vsel %vm434_vm0, 1.0, %v1523_v39 }
  0x31   : > { %v1651_v52 = vsel %vm435_vm7, 1.0, %v1523_v39  ;;  %v1653_v53 = vsel %vm436_vm10, 1.0, %v1523_v39  ;;  %v1655_v54 = vsel %vm437_vm11, 1.0, %v1523_v39 }
  0x32   : > { %449 = sbr.rel (%p1407_p2) target bundleno = 57 (0x39), region = 48 }
  0x35   : > { %v1657_v55 = vpop.eup %1465 }
  0x36   : > { %v1659_v56 = vpop.eup %1467 }
  0x37   : > { %v1661_v57 = vpop.eup %1469 }
  0x38   : > { %v1663_v58 = vpop.eup %1471 }
  0x39 PF: > { %s1408_s24 = sld [smem:[#allocation4 + $0x1]]  ;;  %s1409_s25 = sld [smem:[#allocation4 + $0x2]] }
  0x3a   : > { %s478_s26 = sld [smem:[#allocation4]]  ;;  %s1410_s27 = sld [smem:[#allocation4 + $0x3]] }
  0x3b   : > { %s1666_s28 = sld [smem:[#allocation4 + $0x4]]  ;;  %s1824_s29 = sld [smem:[#allocation4 + $0x5]] }
  0x3c   : > { %s1853_s30 = sld [smem:[#allocation4 + $0x6]]  ;;  %s1870_s6 = sld [smem:[#allocation4 + $0x7]] }
  0x3d   : > { %s1964_s7 = sld [smem:[#allocation4 + $0x8]]  ;;  %s2027_s8 = sld [smem:[#allocation4 + $0x9]] }
  0x3e   : > { %s2029_s9 = sld [smem:[#allocation4 + $0xa]]  ;;  %s2038_s10 = sld [smem:[#allocation4 + $0xb]] }
  0x3f   : > { %v485_v60 = vstv %s1408_s24  ;;  %v1668_v61 = vstv %s1409_s25  ;;  %s2040_s11 = sld [smem:[#allocation4 + $0xc]]  ;;  %s2195_s12 = sld [smem:[#allocation4 + $0xd]] }
  0x40   : > { %vm531_vm14 = vcmp.gt.f32.partialorder %v1657_v55, %v485_v60  ;;  %vm532_vm15 = vcmp.gt.f32.partialorder %v1659_v56, %v485_v60  ;;  %vm533_vm0 = vcmp.gt.f32.partialorder %v1661_v57, %v485_v60  ;;  %vm534_vm1 = vcmp.gt.f32.partialorder %v1663_v58, %v485_v60  ;;  %s2204_s13 = sld [smem:[#allocation4 + $0xe]]  ;;  %s2206_s14 = sld [smem:[#allocation4 + $0xf]] }
  0x41   : > { %vm536_vm2 = vcmp.le.f32.partialorder %v1657_v55, %v1668_v61  ;;  %vm537_vm3 = vcmp.le.f32.partialorder %v1659_v56, %v1668_v61  ;;  %vm538_vm4 = vcmp.le.f32.partialorder %v1661_v57, %v1668_v61  ;;  %vm539_vm5 = vcmp.le.f32.partialorder %v1663_v58, %v1668_v61  ;;  %p1423_p3 = scmp.ne.s32.totalorder %s1512_s18, 1 }
  0x42   : > { %vm540_vm6 = vmand %vm531_vm14, %vm536_vm2  ;;  %v480_v62 = vstv %s478_s26  ;;  %vm486_vm7 = vcmp.le.f32.partialorder %v1657_v55, %v485_v60  ;;  %vm487_vm8 = vcmp.le.f32.partialorder %v1659_v56, %v485_v60  ;;  %vm488_vm9 = vcmp.le.f32.partialorder %v1661_v57, %v485_v60 }
  0x43   : > { %vm541_vm10 = vmand %vm532_vm15, %vm537_vm3  ;;  %v1686_v63 = vsel %vm540_vm6, %v1649_v51, 0.0  ;;  %vm481_vm11 = vcmp.gt.f32.partialorder %v1657_v55, %v480_v62  ;;  %vm482_vm12 = vcmp.gt.f32.partialorder %v1659_v56, %v480_v62  ;;  %vm483_vm13 = vcmp.gt.f32.partialorder %v1661_v57, %v480_v62 }
  0x44   : > { %vm542_vm14 = vmand %vm533_vm0, %vm538_vm4  ;;  %v1694_v0 = vsel %vm541_vm10, %v1651_v52, 0.0  ;;  %vm484_vm2 = vcmp.gt.f32.partialorder %v1663_v58, %v480_v62  ;;  %vm489_vm15 = vcmp.le.f32.partialorder %v1663_v58, %v485_v60  ;;  %v1698_v1 = vstv %s1410_s27 }
  0x45   : > { %vm543_vm3 = vmand %vm534_vm1, %vm539_vm5  ;;  %v1706_v3 = vsel %vm542_vm14, %v1653_v53, 0.0  ;;  %v556_v4 = vadd.f32 %v1694_v0, %v1686_v63  ;;  %vm631_vm0 = vcmp.gt.f32.partialorder %v1657_v55, %v1698_v1  ;;  %vm632_vm4 = vcmp.gt.f32.partialorder %v1659_v56, %v1698_v1 }
  0x46   : > { %v1715_v5 = vsel %vm543_vm3, %v1655_v54, 0.0  ;;  %vm490_vm6 = vmand %vm481_vm11, %vm486_vm7  ;;  %vm633_vm1 = vcmp.gt.f32.partialorder %v1661_v57, %v1698_v1  ;;  %vm634_vm5 = vcmp.gt.f32.partialorder %v1663_v58, %v1698_v1  ;;  %v1724_v6 = vstv %s1666_s28 }
  0x47   : > { %v557_v7 = vadd.f32 %v556_v4, %v1706_v3  ;;  %vm491_vm10 = vmand %vm482_vm12, %vm487_vm8  ;;  %v494_v8 = vsel %vm490_vm6, %v1649_v51, 0.0  ;;  %vm636_vm7 = vcmp.le.f32.partialorder %v1657_v55, %v1724_v6  ;;  %vm637_vm11 = vcmp.le.f32.partialorder %v1659_v56, %v1724_v6 }
  0x48   : > { %vm492_vm14 = vmand %vm483_vm13, %vm488_vm9  ;;  %v495_v9 = vsel %vm491_vm10, %v1651_v52, 0.0  ;;  %vm638_vm3 = vcmp.le.f32.partialorder %v1661_v57, %v1724_v6  ;;  %vm639_vm8 = vcmp.le.f32.partialorder %v1663_v58, %v1724_v6  ;;  %vm582_vm9 = vcmp.gt.f32.partialorder %v1659_v56, %v1668_v61 }
  0x49   : > { %v558_v10 = vadd.f32 %v557_v7, %v1715_v5  ;;  %vm493_vm6 = vmand %vm484_vm2, %vm489_vm15  ;;  %v496_v11 = vsel %vm492_vm14, %v1653_v53, 0.0  ;;  %v506_v12 = vadd.f32 %v495_v9, %v494_v8  ;;  %vm583_vm10 = vcmp.gt.f32.partialorder %v1661_v57, %v1668_v61 }
  0x4a   : > { %v497_v13 = vsel %vm493_vm6, %v1655_v54, 0.0  ;;  %vm640_vm13 = vmand %vm631_vm0, %vm636_vm7  ;;  %vm584_vm12 = vcmp.gt.f32.partialorder %v1663_v58, %v1668_v61  ;;  %vm586_vm2 = vcmp.le.f32.partialorder %v1657_v55, %v1698_v1  ;;  %vm587_vm0 = vcmp.le.f32.partialorder %v1659_v56, %v1698_v1 }
  0x4b   : > { %559 = vadd.xlane.f32.xlu1 %v558_v10  ;;  %v507_v14 = vadd.f32 %v506_v12, %v496_v11  ;;  %vm641_vm15 = vmand %vm632_vm4, %vm637_vm11  ;;  %v1772_v15 = vsel %vm640_vm13, %v1649_v51, 0.0  ;;  %vm588_vm7 = vcmp.le.f32.partialorder %v1661_v57, %v1698_v1  ;;  %vm589_vm4 = vcmp.le.f32.partialorder %v1663_v58, %v1698_v1 }
  0x4c   : > { %vm642_vm14 = vmand %vm633_vm1, %vm638_vm3  ;;  %v1785_v16 = vsel %vm641_vm15, %v1651_v52, 0.0  ;;  %v502_v17 = vmul.f32 %v1628_v40, %v494_v8  ;;  %v503_v18 = vmul.f32 %v1630_v41, %v495_v9  ;;  %v504_v22 = vmul.f32 %v1632_v42, %v496_v11 }
  0x4d   : > { %v508_v19 = vadd.f32 %v507_v14, %v497_v13  ;;  %vm643_vm11 = vmand %vm634_vm5, %vm639_vm8  ;;  %v1798_v20 = vsel %vm642_vm14, %v1653_v53, 0.0  ;;  %v656_v21 = vadd.f32 %v1785_v16, %v1772_v15  ;;  %vm2524_vm1 = vcmp.gt.f32.partialorder %v1657_v55, %v1668_v61 }
  0x4e   : > { %v1804_v23 = vsel %vm643_vm11, %v1655_v54, 0.0  ;;  %vm590_vm3 = vmand %vm2524_vm1, %vm586_vm2  ;;  %v505_v24 = vmul.f32 %v1634_v43, %v497_v13  ;;  %v516_v25 = vadd.f32 %v503_v18, %v502_v17  ;;  %v498_v26 = vmul.f32 %v1657_v55, %v494_v8 }
  0x4f   : > { %509 = vadd.xlane.f32.xlu0 %v508_v19  ;;  %v657_v27 = vadd.f32 %v656_v21, %v1798_v20  ;;  %vm591_vm5 = vmand %vm582_vm9, %vm587_vm0  ;;  %v594_v28 = vsel %vm590_vm3, %v1649_v51, 0.0  ;;  %v499_v29 = vmul.f32 %v1659_v56, %v495_v9  ;;  %v500_v30 = vmul.f32 %v1661_v57, %v496_v11 }
  0x50   : > { %vm592_vm8 = vmand %vm583_vm10, %vm588_vm7  ;;  %v595_v31 = vsel %vm591_vm5, %v1651_v52, 0.0  ;;  %v517_v32 = vadd.f32 %v516_v25, %v504_v22  ;;  %v501_v33 = vmul.f32 %v1663_v58, %v497_v13  ;;  %v552_v34 = vmul.f32 %v1628_v40, %v1686_v63 }
  0x51   : > { %v658_v35 = vadd.f32 %v657_v27, %v1804_v23  ;;  %vm593_vm6 = vmand %vm584_vm12, %vm589_vm4  ;;  %v596_v36 = vsel %vm592_vm8, %v1653_v53, 0.0  ;;  %v606_v37 = vadd.f32 %v595_v31, %v594_v28  ;;  %v511_v38 = vadd.f32 %v499_v29, %v498_v26 }
  0x52   : > { %v597_v39 = vsel %vm593_vm6, %v1655_v54, 0.0  ;;  %v518_v44 = vadd.f32 %v517_v32, %v505_v24  ;;  %v553_v45 = vmul.f32 %v1630_v41, %v1694_v0  ;;  %v554_v46 = vmul.f32 %v1632_v42, %v1706_v3 }
  0x53   : > { %659 = vadd.xlane.f32.xlu1 %v658_v35  ;;  %v607_v59 = vadd.f32 %v606_v37, %v596_v36  ;;  %v512_v60 = vadd.f32 %v511_v38, %v500_v30  ;;  %v555_v61 = vmul.f32 %v1634_v43, %v1715_v5  ;;  %v548_v62 = vmul.f32 %v1657_v55, %v1686_v63 }
  0x54   : > { %v566_v1 = vadd.f32 %v553_v45, %v552_v34  ;;  %v549_v4 = vmul.f32 %v1659_v56, %v1694_v0  ;;  %v550_v7 = vmul.f32 %v1661_v57, %v1706_v3  ;;  %v551_v8 = vmul.f32 %v1663_v58, %v1715_v5 }
  0x55   : > { %v608_v9 = vadd.f32 %v607_v59, %v597_v39  ;;  %v513_v10 = vadd.f32 %v512_v60, %v501_v33  ;;  %v598_v11 = vmul.f32 %v1657_v55, %v594_v28  ;;  %v599_v12 = vmul.f32 %v1659_v56, %v595_v31 }
  0x56   : > { %v567_v63 = vadd.f32 %v566_v1, %v554_v46  ;;  %v561_v13 = vadd.f32 %v549_v4, %v548_v62  ;;  %v600_v14 = vmul.f32 %v1661_v57, %v596_v36  ;;  %v601_v17 = vmul.f32 %v1663_v58, %v597_v39 }
  0x57   : > { %609 = vadd.xlane.f32.xlu0 %v608_v9  ;;  %519 = vadd.xlane.f32.xlu1 %v518_v44  ;;  %v611_v0 = vadd.f32 %v599_v12, %v598_v11  ;;  %v602_v3 = vmul.f32 %v1628_v40, %v594_v28  ;;  %v603_v18 = vmul.f32 %v1630_v41, %v595_v31  ;;  %v1868_v5 = vstv %s1824_s29 }
  0x58   : > { %v568_v19 = vadd.f32 %v567_v63, %v555_v61  ;;  %v562_v21 = vadd.f32 %v561_v13, %v550_v7  ;;  %v604_v22 = vmul.f32 %v1632_v42, %v596_v36  ;;  %v605_v24 = vmul.f32 %v1634_v43, %v597_v39 }
  0x59   : > { %v612_v25 = vadd.f32 %v611_v0, %v600_v14  ;;  %v616_v26 = vadd.f32 %v603_v18, %v602_v3  ;;  %v652_v27 = vmul.f32 %v1628_v40, %v1772_v15  ;;  %v653_v28 = vmul.f32 %v1630_v41, %v1785_v16 }
  0x5a   : > { %v563_v29 = vadd.f32 %v562_v21, %v551_v8  ;;  %v654_v30 = vmul.f32 %v1632_v42, %v1798_v20  ;;  %v655_v31 = vmul.f32 %v1634_v43, %v1804_v23  ;;  %v648_v32 = vmul.f32 %v1657_v55, %v1772_v15 }
  0x5b   : > { %514 = vadd.xlane.f32.xlu0 %v513_v10  ;;  %569 = vadd.xlane.f32.xlu1 %v568_v19  ;;  %v613_v33 = vadd.f32 %v612_v25, %v601_v17  ;;  %v617_v34 = vadd.f32 %v616_v26, %v604_v22  ;;  %v666_v35 = vadd.f32 %v653_v28, %v652_v27  ;;  %v1885_v36 = vstv %s1853_s30 }
  0x5c   : > { %v649_v37 = vmul.f32 %v1659_v56, %v1785_v16  ;;  %v650_v38 = vmul.f32 %v1661_v57, %v1798_v20  ;;  %v651_v39 = vmul.f32 %v1663_v58, %v1804_v23  ;;  %vm681_vm12 = vcmp.gt.f32.partialorder %v1657_v55, %v1724_v6 }
  0x5d   : > { %v618_v15 = vadd.f32 %v617_v34, %v605_v24  ;;  %v667_v44 = vadd.f32 %v666_v35, %v654_v30  ;;  %vm682_vm9 = vcmp.gt.f32.partialorder %v1659_v56, %v1724_v6  ;;  %vm683_vm13 = vcmp.gt.f32.partialorder %v1661_v57, %v1724_v6 }
  0x5e   : > { %v661_v45 = vadd.f32 %v649_v37, %v648_v32  ;;  %vm684_vm10 = vcmp.gt.f32.partialorder %v1663_v58, %v1724_v6  ;;  %vm686_vm2 = vcmp.le.f32.partialorder %v1657_v55, %v1868_v5  ;;  %vm687_vm15 = vcmp.le.f32.partialorder %v1659_v56, %v1868_v5 }
  0x5f   : > { %564 = vadd.xlane.f32.xlu0 %v563_v29  ;;  %614 = vadd.xlane.f32.xlu1 %v613_v33  ;;  %v668_v16 = vadd.f32 %v667_v44, %v655_v31  ;;  %vm688_vm0 = vcmp.le.f32.partialorder %v1661_v57, %v1868_v5  ;;  %vm689_vm7 = vcmp.le.f32.partialorder %v1663_v58, %v1868_v5  ;;  %vm690_vm14 = vmand %vm681_vm12, %vm686_vm2  ;;  %v1910_v20 = vstv %s1870_s6 }
  0x60   : > { %v662_v23 = vadd.f32 %v661_v45, %v650_v38  ;;  %vm691_vm4 = vmand %vm682_vm9, %vm687_vm15  ;;  %v694_v46 = vsel %vm690_vm14, %v1649_v51, 0.0  ;;  %vm731_vm11 = vcmp.gt.f32.partialorder %v1657_v55, %v1868_v5  ;;  %vm732_vm1 = vcmp.gt.f32.partialorder %v1659_v56, %v1868_v5 }
  0x61   : > { %vm692_vm3 = vmand %vm683_vm13, %vm688_vm0  ;;  %v695_v59 = vsel %vm691_vm4, %v1651_v52, 0.0  ;;  %v698_v60 = vmul.f32 %v1657_v55, %v694_v46  ;;  %vm733_vm5 = vcmp.gt.f32.partialorder %v1661_v57, %v1868_v5  ;;  %vm734_vm8 = vcmp.gt.f32.partialorder %v1663_v58, %v1868_v5 }
  0x62   : > { %v663_v61 = vadd.f32 %v662_v23, %v651_v39  ;;  %vm693_vm6 = vmand %vm684_vm10, %vm689_vm7  ;;  %v696_v62 = vsel %vm692_vm3, %v1653_v53, 0.0  ;;  %v699_v1 = vmul.f32 %v1659_v56, %v695_v59  ;;  %v706_v4 = vadd.f32 %v695_v59, %v694_v46 }
  0x63   : > { %619 = vadd.xlane.f32.xlu0 %v618_v15  ;;  %669 = vadd.xlane.f32.xlu1 %v668_v16  ;;  %v697_v7 = vsel %vm693_vm6, %v1655_v54, 0.0  ;;  %v700_v8 = vmul.f32 %v1661_v57, %v696_v62  ;;  %vm736_vm12 = vcmp.le.f32.partialorder %v1657_v55, %v1885_v36  ;;  %vm737_vm9 = vcmp.le.f32.partialorder %v1659_v56, %v1885_v36 }
  0x64   : > { %v701_v6 = vmul.f32 %v1663_v58, %v697_v7  ;;  %v711_v9 = vadd.f32 %v699_v1, %v698_v60  ;;  %v707_v10 = vadd.f32 %v706_v4, %v696_v62  ;;  %vm738_vm13 = vcmp.le.f32.partialorder %v1661_v57, %v1885_v36  ;;  %vm740_vm10 = vmand %vm731_vm11, %vm736_vm12 }
  0x65   : > { %vm739_vm2 = vcmp.le.f32.partialorder %v1663_v58, %v1885_v36  ;;  %vm741_vm15 = vmand %vm732_vm1, %vm737_vm9  ;;  %v744_v11 = vsel %vm740_vm10, %v1649_v51, 0.0  ;;  %v702_v12 = vmul.f32 %v1628_v40, %v694_v46  ;;  %v703_v63 = vmul.f32 %v1630_v41, %v695_v59 }
  0x66   : > { %v712_v13 = vadd.f32 %v711_v9, %v700_v8  ;;  %v708_v14 = vadd.f32 %v707_v10, %v697_v7  ;;  %vm742_vm0 = vmand %vm733_vm5, %vm738_vm13  ;;  %v745_v17 = vsel %vm741_vm15, %v1651_v52, 0.0  ;;  %v704_v0 = vmul.f32 %v1632_v42, %v696_v62 }
  0x67   : > { %664 = vadd.xlane.f32.xlu0 %v663_v61  ;;  %vm743_vm7 = vmand %vm734_vm8, %vm739_vm2  ;;  %v746_v3 = vsel %vm742_vm0, %v1653_v53, 0.0  ;;  %v756_v18 = vadd.f32 %v745_v17, %v744_v11  ;;  %v705_v19 = vmul.f32 %v1634_v43, %v697_v7  ;;  %v716_v21 = vadd.f32 %v703_v63, %v702_v12 }
  0x68   : > { %v713_v22 = vadd.f32 %v712_v13, %v701_v6  ;;  %v747_v24 = vsel %vm743_vm7, %v1655_v54, 0.0  ;;  %v752_v25 = vmul.f32 %v1628_v40, %v744_v11  ;;  %v753_v26 = vmul.f32 %v1630_v41, %v745_v17 }
  0x69   : > { %v757_v27 = vadd.f32 %v756_v18, %v746_v3  ;;  %v717_v28 = vadd.f32 %v716_v21, %v704_v0  ;;  %v754_v5 = vmul.f32 %v1632_v42, %v746_v3  ;;  %v755_v29 = vmul.f32 %v1634_v43, %v747_v24 }
  0x6a   : > { %714 = vadd.xlane.f32.xlu1 %v713_v22  ;;  %v766_v30 = vadd.f32 %v753_v26, %v752_v25  ;;  %v748_v31 = vmul.f32 %v1657_v55, %v744_v11  ;;  %v749_v32 = vmul.f32 %v1659_v56, %v745_v17  ;;  %v750_v33 = vmul.f32 %v1661_v57, %v746_v3 }
  0x6b   : > { %709 = vadd.xlane.f32.xlu0 %v708_v14  ;;  %v758_v34 = vadd.f32 %v757_v27, %v747_v24  ;;  %v718_v35 = vadd.f32 %v717_v28, %v705_v19  ;;  %v751_v37 = vmul.f32 %v1663_v58, %v747_v24  ;;  %vm781_vm14 = vcmp.gt.f32.partialorder %v1657_v55, %v1885_v36 }
  0x6c   : > { %v767_v38 = vadd.f32 %v766_v30, %v754_v5  ;;  %v761_v39 = vadd.f32 %v749_v32, %v748_v31  ;;  %vm782_vm4 = vcmp.gt.f32.partialorder %v1659_v56, %v1885_v36  ;;  %vm783_vm11 = vcmp.gt.f32.partialorder %v1661_v57, %v1885_v36 }
  0x6d   : > { %vm784_vm1 = vcmp.gt.f32.partialorder %v1663_v58, %v1885_v36  ;;  %vm786_vm3 = vcmp.le.f32.partialorder %v1657_v55, %v1910_v20  ;;  %vm787_vm5 = vcmp.le.f32.partialorder %v1659_v56, %v1910_v20  ;;  %vm788_vm8 = vcmp.le.f32.partialorder %v1661_v57, %v1910_v20 }
  0x6e   : > { %759 = vadd.xlane.f32.xlu1 %v758_v34  ;;  %v768_v15 = vadd.f32 %v767_v38, %v755_v29  ;;  %v762_v44 = vadd.f32 %v761_v39, %v750_v33  ;;  %vm789_vm6 = vcmp.le.f32.partialorder %v1663_v58, %v1910_v20  ;;  %vm790_vm12 = vmand %vm781_vm14, %vm786_vm3  ;;  %vm831_vm9 = vcmp.gt.f32.partialorder %v1657_v55, %v1910_v20 }
  0x6f   : > { %719 = vadd.xlane.f32.xlu0 %v718_v35  ;;  %vm791_vm13 = vmand %vm782_vm4, %vm787_vm5  ;;  %v794_v45 = vsel %vm790_vm12, %v1649_v51, 0.0  ;;  %vm832_vm10 = vcmp.gt.f32.partialorder %v1659_v56, %v1910_v20  ;;  %vm833_vm2 = vcmp.gt.f32.partialorder %v1661_v57, %v1910_v20  ;;  %vm834_vm15 = vcmp.gt.f32.partialorder %v1663_v58, %v1910_v20 }
  0x70   : > { %v763_v16 = vadd.f32 %v762_v44, %v751_v37  ;;  %vm792_vm0 = vmand %vm783_vm11, %vm788_vm8  ;;  %v795_v23 = vsel %vm791_vm13, %v1651_v52, 0.0  ;;  %v798_v46 = vmul.f32 %v1657_v55, %v794_v45  ;;  %v2003_v59 = vstv %s1964_s7 }
  0x71   : > { %vm793_vm7 = vmand %vm784_vm1, %vm789_vm6  ;;  %v796_v60 = vsel %vm792_vm0, %v1653_v53, 0.0  ;;  %v799_v61 = vmul.f32 %v1659_v56, %v795_v23  ;;  %v806_v62 = vadd.f32 %v795_v23, %v794_v45  ;;  %vm836_vm14 = vcmp.le.f32.partialorder %v1657_v55, %v2003_v59 }
  0x72   : > { %769 = vadd.xlane.f32.xlu1 %v768_v15  ;;  %v797_v1 = vsel %vm793_vm7, %v1655_v54, 0.0  ;;  %v800_v4 = vmul.f32 %v1661_v57, %v796_v60  ;;  %vm837_vm4 = vcmp.le.f32.partialorder %v1659_v56, %v2003_v59  ;;  %vm838_vm11 = vcmp.le.f32.partialorder %v1661_v57, %v2003_v59  ;;  %vm840_vm1 = vmand %vm831_vm9, %vm836_vm14 }
  0x73   : > { %764 = vadd.xlane.f32.xlu0 %v763_v16  ;;  %v801_v36 = vmul.f32 %v1663_v58, %v797_v1  ;;  %v811_v7 = vadd.f32 %v799_v61, %v798_v46  ;;  %v807_v8 = vadd.f32 %v806_v62, %v796_v60  ;;  %vm839_vm3 = vcmp.le.f32.partialorder %v1663_v58, %v2003_v59  ;;  %vm841_vm5 = vmand %vm832_vm10, %vm837_vm4 }
  0x74   : > { %vm842_vm8 = vmand %vm833_vm2, %vm838_vm11  ;;  %v844_v6 = vsel %vm840_vm1, %v1649_v51, 0.0  ;;  %v845_v9 = vsel %vm841_vm5, %v1651_v52, 0.0  ;;  %v802_v10 = vmul.f32 %v1628_v40, %v794_v45  ;;  %v803_v11 = vmul.f32 %v1630_v41, %v795_v23 }
  0x75   : > { %v812_v12 = vadd.f32 %v811_v7, %v800_v4  ;;  %v808_v63 = vadd.f32 %v807_v8, %v797_v1  ;;  %vm843_vm6 = vmand %vm834_vm15, %vm839_vm3  ;;  %v846_v13 = vsel %vm842_vm8, %v1653_v53, 0.0  ;;  %v856_v14 = vadd.f32 %v845_v9, %v844_v6 }
  0x76   : > { %v847_v17 = vsel %vm843_vm6, %v1655_v54, 0.0  ;;  %v804_v0 = vmul.f32 %v1632_v42, %v796_v60  ;;  %v805_v3 = vmul.f32 %v1634_v43, %v797_v1  ;;  %v816_v18 = vadd.f32 %v803_v11, %v802_v10 }
  0x77   : > { %v813_v19 = vadd.f32 %v812_v12, %v801_v36  ;;  %809 = vadd.xlane.f32.xlu0 %v808_v63  ;;  %v857_v21 = vadd.f32 %v856_v14, %v846_v13  ;;  %v852_v22 = vmul.f32 %v1628_v40, %v844_v6  ;;  %v853_v24 = vmul.f32 %v1630_v41, %v845_v9 }
  0x78   : > { %v817_v25 = vadd.f32 %v816_v18, %v804_v0  ;;  %v854_v20 = vmul.f32 %v1632_v42, %v846_v13  ;;  %v855_v26 = vmul.f32 %v1634_v43, %v847_v17  ;;  %v848_v27 = vmul.f32 %v1657_v55, %v844_v6 }
  0x79   : > { %814 = vadd.xlane.f32.xlu1 %v813_v19  ;;  %v858_v28 = vadd.f32 %v857_v21, %v847_v17  ;;  %v866_v5 = vadd.f32 %v853_v24, %v852_v22  ;;  %v849_v29 = vmul.f32 %v1659_v56, %v845_v9  ;;  %v850_v30 = vmul.f32 %v1661_v57, %v846_v13 }
  0x7a   : > { %v818_v31 = vadd.f32 %v817_v25, %v805_v3  ;;  %v851_v32 = vmul.f32 %v1663_v58, %v847_v17  ;;  %vm881_vm12 = vcmp.gt.f32.partialorder %v1657_v55, %v2003_v59  ;;  %vm882_vm9 = vcmp.gt.f32.partialorder %v1659_v56, %v2003_v59 }
  0x7b   : > { %v867_v33 = vadd.f32 %v866_v5, %v854_v20  ;;  %v861_v34 = vadd.f32 %v849_v29, %v848_v27  ;;  %vm883_vm13 = vcmp.gt.f32.partialorder %v1661_v57, %v2003_v59  ;;  %vm884_vm10 = vcmp.gt.f32.partialorder %v1663_v58, %v2003_v59 }
  0x7c   : > { %819 = vadd.xlane.f32.xlu0 %v818_v31  ;;  %v885_v35 = vstv %s2027_s8  ;;  %v2067_v37 = vstv %s2029_s9  ;;  %v2070_v38 = vstv %s2038_s10  ;;  %v2073_v39 = vstv %s2040_s11 }
  0x7d   : > { %859 = vadd.xlane.f32.xlu1 %v858_v28  ;;  %v868_v15 = vadd.f32 %v867_v33, %v855_v26  ;;  %v862_v44 = vadd.f32 %v861_v34, %v850_v30  ;;  %vm886_vm2 = vcmp.le.f32.partialorder %v1657_v55, %v885_v35  ;;  %vm887_vm15 = vcmp.le.f32.partialorder %v1659_v56, %v885_v35 }
  0x7e   : > { %vm888_vm0 = vcmp.le.f32.partialorder %v1661_v57, %v885_v35  ;;  %vm889_vm7 = vcmp.le.f32.partialorder %v1663_v58, %v885_v35  ;;  %vm890_vm14 = vmand %vm881_vm12, %vm886_vm2  ;;  %vm931_vm4 = vcmp.gt.f32.partialorder %v1657_v55, %v885_v35  ;;  %vm932_vm11 = vcmp.gt.f32.partialorder %v1659_v56, %v885_v35 }
  0x7f   : > { %v863_v45 = vadd.f32 %v862_v44, %v851_v32  ;;  %vm891_vm1 = vmand %vm882_vm9, %vm887_vm15  ;;  %v894_v16 = vsel %vm890_vm14, %v1649_v51, 0.0  ;;  %vm933_vm3 = vcmp.gt.f32.partialorder %v1661_v57, %v885_v35  ;;  %vm934_vm5 = vcmp.gt.f32.partialorder %v1663_v58, %v885_v35 }
  0x80   : > { %vm892_vm8 = vmand %vm883_vm13, %vm888_vm0  ;;  %v895_v23 = vsel %vm891_vm1, %v1651_v52, 0.0  ;;  %v898_v46 = vmul.f32 %v1657_v55, %v894_v16  ;;  %vm936_vm6 = vcmp.le.f32.partialorder %v1657_v55, %v2067_v37  ;;  %vm937_vm12 = vcmp.le.f32.partialorder %v1659_v56, %v2067_v37 }
  0x81   : > { %869 = vadd.xlane.f32.xlu1 %v868_v15  ;;  %864 = vadd.xlane.f32.xlu0 %v863_v45  ;;  %vm893_vm9 = vmand %vm884_vm10, %vm889_vm7  ;;  %v896_v60 = vsel %vm892_vm8, %v1653_v53, 0.0  ;;  %v899_v61 = vmul.f32 %v1659_v56, %v895_v23  ;;  %v906_v62 = vadd.f32 %v895_v23, %v894_v16  ;;  %vm938_vm13 = vcmp.le.f32.partialorder %v1661_v57, %v2067_v37 }
  0x82   : > { %v897_v1 = vsel %vm893_vm9, %v1655_v54, 0.0  ;;  %v900_v4 = vmul.f32 %v1661_v57, %v896_v60  ;;  %vm939_vm2 = vcmp.le.f32.partialorder %v1663_v58, %v2067_v37  ;;  %vm940_vm15 = vmand %vm931_vm4, %vm936_vm6  ;;  %v902_v59 = vmul.f32 %v1628_v40, %v894_v16 }
  0x83   : > { %v901_v36 = vmul.f32 %v1663_v58, %v897_v1  ;;  %v911_v7 = vadd.f32 %v899_v61, %v898_v46  ;;  %v907_v8 = vadd.f32 %v906_v62, %v896_v60  ;;  %vm941_vm10 = vmand %vm932_vm11, %vm937_vm12  ;;  %v944_v6 = vsel %vm940_vm15, %v1649_v51, 0.0 }
  0x84   : > { %vm942_vm0 = vmand %vm933_vm3, %vm938_vm13  ;;  %v945_v9 = vsel %vm941_vm10, %v1651_v52, 0.0  ;;  %v903_v10 = vmul.f32 %v1630_v41, %v895_v23  ;;  %v904_v11 = vmul.f32 %v1632_v42, %v896_v60  ;;  %v905_v12 = vmul.f32 %v1634_v43, %v897_v1 }
  0x85   : > { %v912_v63 = vadd.f32 %v911_v7, %v900_v4  ;;  %v908_v13 = vadd.f32 %v907_v8, %v897_v1  ;;  %vm943_vm7 = vmand %vm934_vm5, %vm939_vm2  ;;  %v946_v14 = vsel %vm942_vm0, %v1653_v53, 0.0  ;;  %v956_v17 = vadd.f32 %v945_v9, %v944_v6 }
  0x86   : > { %v947_v0 = vsel %vm943_vm7, %v1655_v54, 0.0  ;;  %v916_v3 = vadd.f32 %v903_v10, %v902_v59  ;;  %v952_v18 = vmul.f32 %v1628_v40, %v944_v6  ;;  %v953_v19 = vmul.f32 %v1630_v41, %v945_v9 }
  0x87   : > { %v913_v21 = vadd.f32 %v912_v63, %v901_v36  ;;  %909 = vadd.xlane.f32.xlu0 %v908_v13  ;;  %v957_v22 = vadd.f32 %v956_v17, %v946_v14  ;;  %v954_v24 = vmul.f32 %v1632_v42, %v946_v14  ;;  %v955_v25 = vmul.f32 %v1634_v43, %v947_v0 }
  0x88   : > { %v917_v20 = vadd.f32 %v916_v3, %v904_v11  ;;  %v966_v26 = vadd.f32 %v953_v19, %v952_v18  ;;  %v948_v27 = vmul.f32 %v1657_v55, %v944_v6  ;;  %v949_v28 = vmul.f32 %v1659_v56, %v945_v9 }
  0x89   : > { %914 = vadd.xlane.f32.xlu1 %v913_v21  ;;  %v958_v5 = vadd.f32 %v957_v22, %v947_v0  ;;  %v950_v29 = vmul.f32 %v1661_v57, %v946_v14  ;;  %v951_v30 = vmul.f32 %v1663_v58, %v947_v0  ;;  %vm981_vm14 = vcmp.gt.f32.partialorder %v1657_v55, %v2067_v37 }
  0x8a   : > { %v918_v31 = vadd.f32 %v917_v20, %v905_v12  ;;  %v967_v32 = vadd.f32 %v966_v26, %v954_v24  ;;  %v961_v33 = vadd.f32 %v949_v28, %v948_v27  ;;  %vm982_vm4 = vcmp.gt.f32.partialorder %v1659_v56, %v2067_v37 }
  0x8b   : > { %vm983_vm11 = vcmp.gt.f32.partialorder %v1661_v57, %v2067_v37  ;;  %vm984_vm1 = vcmp.gt.f32.partialorder %v1663_v58, %v2067_v37  ;;  %vm986_vm3 = vcmp.le.f32.partialorder %v1657_v55, %v2070_v38  ;;  %vm987_vm5 = vcmp.le.f32.partialorder %v1659_v56, %v2070_v38 }
  0x8c   : > { %919 = vadd.xlane.f32.xlu0 %v918_v31  ;;  %v968_v34 = vadd.f32 %v967_v32, %v955_v25  ;;  %v962_v35 = vadd.f32 %v961_v33, %v950_v29  ;;  %vm988_vm8 = vcmp.le.f32.partialorder %v1661_v57, %v2070_v38  ;;  %vm989_vm6 = vcmp.le.f32.partialorder %v1663_v58, %v2070_v38  ;;  %vm990_vm12 = vmand %vm981_vm14, %vm986_vm3 }
  0x8d   : > { %959 = vadd.xlane.f32.xlu1 %v958_v5  ;;  %vm991_vm9 = vmand %vm982_vm4, %vm987_vm5  ;;  %v994_v15 = vsel %vm990_vm12, %v1649_v51, 0.0  ;;  %vm1031_vm13 = vcmp.gt.f32.partialorder %v1657_v55, %v2070_v38  ;;  %vm1032_vm2 = vcmp.gt.f32.partialorder %v1659_v56, %v2070_v38  ;;  %vm1033_vm15 = vcmp.gt.f32.partialorder %v1661_v57, %v2070_v38 }
  0x8e   : > { %v963_v44 = vadd.f32 %v962_v35, %v951_v30  ;;  %vm992_vm10 = vmand %vm983_vm11, %vm988_vm8  ;;  %v995_v45 = vsel %vm991_vm9, %v1651_v52, 0.0  ;;  %v998_v16 = vmul.f32 %v1657_v55, %v994_v15  ;;  %vm1034_vm0 = vcmp.gt.f32.partialorder %v1663_v58, %v2070_v38 }
  0x8f   : > { %vm993_vm7 = vmand %vm984_vm1, %vm989_vm6  ;;  %v996_v23 = vsel %vm992_vm10, %v1653_v53, 0.0  ;;  %v999_v46 = vmul.f32 %v1659_v56, %v995_v45  ;;  %v1006_v60 = vadd.f32 %v995_v45, %v994_v15  ;;  %vm1036_vm14 = vcmp.le.f32.partialorder %v1657_v55, %v2073_v39 }
  0x90   : > { %964 = vadd.xlane.f32.xlu0 %v963_v44  ;;  %v997_v61 = vsel %vm993_vm7, %v1655_v54, 0.0  ;;  %v1000_v62 = vmul.f32 %v1661_v57, %v996_v23  ;;  %vm1037_vm4 = vcmp.le.f32.partialorder %v1659_v56, %v2073_v39  ;;  %vm1038_vm11 = vcmp.le.f32.partialorder %v1661_v57, %v2073_v39  ;;  %vm1040_vm1 = vmand %vm1031_vm13, %vm1036_vm14 }
  0x91   : > { %969 = vadd.xlane.f32.xlu1 %v968_v34  ;;  %v1001_v37 = vmul.f32 %v1663_v58, %v997_v61  ;;  %v1011_v1 = vadd.f32 %v999_v46, %v998_v16  ;;  %v1007_v4 = vadd.f32 %v1006_v60, %v996_v23  ;;  %vm1039_vm3 = vcmp.le.f32.partialorder %v1663_v58, %v2073_v39  ;;  %vm1041_vm5 = vmand %vm1032_vm2, %vm1037_vm4 }
  0x92   : > { %vm1042_vm8 = vmand %vm1033_vm15, %vm1038_vm11  ;;  %v1044_v59 = vsel %vm1040_vm1, %v1649_v51, 0.0  ;;  %v1045_v36 = vsel %vm1041_vm5, %v1651_v52, 0.0  ;;  %v1002_v7 = vmul.f32 %v1628_v40, %v994_v15  ;;  %v1003_v8 = vmul.f32 %v1630_v41, %v995_v45 }
  0x93   : > { %v1012_v6 = vadd.f32 %v1011_v1, %v1000_v62  ;;  %v1008_v9 = vadd.f32 %v1007_v4, %v997_v61  ;;  %vm1043_vm6 = vmand %vm1034_vm0, %vm1039_vm3  ;;  %v1046_v10 = vsel %vm1042_vm8, %v1653_v53, 0.0  ;;  %v1056_v11 = vadd.f32 %v1045_v36, %v1044_v59 }
  0x94   : > { %v1047_v12 = vsel %vm1043_vm6, %v1655_v54, 0.0  ;;  %v1004_v63 = vmul.f32 %v1632_v42, %v996_v23  ;;  %v1005_v13 = vmul.f32 %v1634_v43, %v997_v61  ;;  %v1016_v14 = vadd.f32 %v1003_v8, %v1002_v7 }
  0x95   : > { %v1013_v17 = vadd.f32 %v1012_v6, %v1001_v37  ;;  %1009 = vadd.xlane.f32.xlu0 %v1008_v9  ;;  %v1057_v0 = vadd.f32 %v1056_v11, %v1046_v10  ;;  %v1052_v3 = vmul.f32 %v1628_v40, %v1044_v59  ;;  %v1053_v18 = vmul.f32 %v1630_v41, %v1045_v36 }
  0x96   : > { %v1017_v19 = vadd.f32 %v1016_v14, %v1004_v63  ;;  %v1054_v38 = vmul.f32 %v1632_v42, %v1046_v10  ;;  %v1055_v21 = vmul.f32 %v1634_v43, %v1047_v12  ;;  %v1048_v22 = vmul.f32 %v1657_v55, %v1044_v59 }
  0x97   : > { %1014 = vadd.xlane.f32.xlu1 %v1013_v17  ;;  %v1058_v24 = vadd.f32 %v1057_v0, %v1047_v12  ;;  %v1066_v25 = vadd.f32 %v1053_v18, %v1052_v3  ;;  %v1049_v20 = vmul.f32 %v1659_v56, %v1045_v36  ;;  %v1050_v26 = vmul.f32 %v1661_v57, %v1046_v10 }
  0x98   : > { %v1018_v27 = vadd.f32 %v1017_v19, %v1005_v13  ;;  %v1051_v28 = vmul.f32 %v1663_v58, %v1047_v12  ;;  %vm1081_vm12 = vcmp.gt.f32.partialorder %v1657_v55, %v2073_v39  ;;  %vm1082_vm9 = vcmp.gt.f32.partialorder %v1659_v56, %v2073_v39 }
  0x99   : > { %v1067_v5 = vadd.f32 %v1066_v25, %v1054_v38  ;;  %v1061_v29 = vadd.f32 %v1049_v20, %v1048_v22  ;;  %vm1083_vm13 = vcmp.gt.f32.partialorder %v1661_v57, %v2073_v39  ;;  %vm1084_vm2 = vcmp.gt.f32.partialorder %v1663_v58, %v2073_v39 }
  0x9a   : > { %1019 = vadd.xlane.f32.xlu0 %v1018_v27  ;;  %v1085_v30 = vstv %s2195_s12  ;;  %v2233_v31 = vstv %s2204_s13  ;;  %v2236_v32 = vstv %s2206_s14 }
  0x9b   : > { %1059 = vadd.xlane.f32.xlu1 %v1058_v24  ;;  %v1068_v33 = vadd.f32 %v1067_v5, %v1055_v21  ;;  %v1062_v34 = vadd.f32 %v1061_v29, %v1050_v26  ;;  %vm1086_vm15 = vcmp.le.f32.partialorder %v1657_v55, %v1085_v30  ;;  %vm1087_vm10 = vcmp.le.f32.partialorder %v1659_v56, %v1085_v30 }
  0x9c   : > { %vm1088_vm0 = vcmp.le.f32.partialorder %v1661_v57, %v1085_v30  ;;  %vm1089_vm7 = vcmp.le.f32.partialorder %v1663_v58, %v1085_v30  ;;  %vm1090_vm14 = vmand %vm1081_vm12, %vm1086_vm15  ;;  %vm1131_vm4 = vcmp.gt.f32.partialorder %v1657_v55, %v1085_v30  ;;  %vm1132_vm11 = vcmp.gt.f32.partialorder %v1659_v56, %v1085_v30 }
  0x9d   : > { %v1063_v35 = vadd.f32 %v1062_v34, %v1051_v28  ;;  %vm1091_vm1 = vmand %vm1082_vm9, %vm1087_vm10  ;;  %v1094_v15 = vsel %vm1090_vm14, %v1649_v51, 0.0  ;;  %vm1133_vm3 = vcmp.gt.f32.partialorder %v1661_v57, %v1085_v30  ;;  %vm1134_vm5 = vcmp.gt.f32.partialorder %v1663_v58, %v1085_v30 }
  0x9e   : > { %vm1092_vm8 = vmand %vm1083_vm13, %vm1088_vm0  ;;  %v1095_v44 = vsel %vm1091_vm1, %v1651_v52, 0.0  ;;  %v1098_v45 = vmul.f32 %v1657_v55, %v1094_v15  ;;  %vm1136_vm6 = vcmp.le.f32.partialorder %v1657_v55, %v2233_v31  ;;  %vm1137_vm12 = vcmp.le.f32.partialorder %v1659_v56, %v2233_v31 }
  0x9f   : > { %1069 = vadd.xlane.f32.xlu1 %v1068_v33  ;;  %1064 = vadd.xlane.f32.xlu0 %v1063_v35  ;;  %vm1093_vm9 = vmand %vm1084_vm2, %vm1089_vm7  ;;  %v1096_v16 = vsel %vm1092_vm8, %v1653_v53, 0.0  ;;  %v1099_v23 = vmul.f32 %v1659_v56, %v1095_v44  ;;  %v1106_v46 = vadd.f32 %v1095_v44, %v1094_v15  ;;  %vm1138_vm13 = vcmp.le.f32.partialorder %v1661_v57, %v2233_v31 }
  0xa0   : > { %v1097_v60 = vsel %vm1093_vm9, %v1655_v54, 0.0  ;;  %v1100_v61 = vmul.f32 %v1661_v57, %v1096_v16  ;;  %vm1139_vm15 = vcmp.le.f32.partialorder %v1663_v58, %v2233_v31  ;;  %vm1140_vm10 = vmand %vm1131_vm4, %vm1136_vm6  ;;  %v1102_v39 = vmul.f32 %v1628_v40, %v1094_v15 }
  0xa1   : > { %v1101_v62 = vmul.f32 %v1663_v58, %v1097_v60  ;;  %v1111_v37 = vadd.f32 %v1099_v23, %v1098_v45  ;;  %v1107_v1 = vadd.f32 %v1106_v46, %v1096_v16  ;;  %vm1141_vm2 = vmand %vm1132_vm11, %vm1137_vm12  ;;  %v1144_v4 = vsel %vm1140_vm10, %v1649_v51, 0.0 }
  0xa2   : > { %vm1142_vm0 = vmand %vm1133_vm3, %vm1138_vm13  ;;  %v1145_v59 = vsel %vm1141_vm2, %v1651_v52, 0.0  ;;  %v1103_v36 = vmul.f32 %v1630_v41, %v1095_v44  ;;  %v1104_v7 = vmul.f32 %v1632_v42, %v1096_v16  ;;  %v1105_v8 = vmul.f32 %v1634_v43, %v1097_v60 }
  0xa3   : > { %v1112_v6 = vadd.f32 %v1111_v37, %v1100_v61  ;;  %v1108_v9 = vadd.f32 %v1107_v1, %v1097_v60  ;;  %vm1143_vm7 = vmand %vm1134_vm5, %vm1139_vm15  ;;  %v1146_v10 = vsel %vm1142_vm0, %v1653_v53, 0.0  ;;  %v1156_v11 = vadd.f32 %v1145_v59, %v1144_v4 }
  0xa4   : > { %v1147_v12 = vsel %vm1143_vm7, %v1655_v54, 0.0  ;;  %v1116_v63 = vadd.f32 %v1103_v36, %v1102_v39  ;;  %v1152_v13 = vmul.f32 %v1628_v40, %v1144_v4  ;;  %v1153_v14 = vmul.f32 %v1630_v41, %v1145_v59 }
  0xa5   : > { %v1113_v17 = vadd.f32 %v1112_v6, %v1101_v62  ;;  %1109 = vadd.xlane.f32.xlu0 %v1108_v9  ;;  %v1157_v0 = vadd.f32 %v1156_v11, %v1146_v10  ;;  %v1154_v3 = vmul.f32 %v1632_v42, %v1146_v10  ;;  %v1155_v18 = vmul.f32 %v1634_v43, %v1147_v12 }
  0xa6   : > { %v1117_v19 = vadd.f32 %v1116_v63, %v1104_v7  ;;  %v1166_v38 = vadd.f32 %v1153_v14, %v1152_v13  ;;  %v1148_v21 = vmul.f32 %v1657_v55, %v1144_v4  ;;  %v1149_v22 = vmul.f32 %v1659_v56, %v1145_v59 }
  0xa7   : > { %1114 = vadd.xlane.f32.xlu1 %v1113_v17  ;;  %v1158_v24 = vadd.f32 %v1157_v0, %v1147_v12  ;;  %v1150_v25 = vmul.f32 %v1661_v57, %v1146_v10  ;;  %v1151_v20 = vmul.f32 %v1663_v58, %v1147_v12  ;;  %vm1181_vm14 = vcmp.gt.f32.partialorder %v1657_v55, %v2233_v31 }
  0xa8   : > { %v1118_v26 = vadd.f32 %v1117_v19, %v1105_v8  ;;  %v1167_v27 = vadd.f32 %v1166_v38, %v1154_v3  ;;  %v1161_v28 = vadd.f32 %v1149_v22, %v1148_v21  ;;  %vm1182_vm4 = vcmp.gt.f32.partialorder %v1659_v56, %v2233_v31 }
  0xa9   : > { %vm1183_vm11 = vcmp.gt.f32.partialorder %v1661_v57, %v2233_v31  ;;  %vm1186_vm1 = vcmp.le.f32.partialorder %v1657_v55, %v2236_v32  ;;  %vm1187_vm3 = vcmp.le.f32.partialorder %v1659_v56, %v2236_v32  ;;  %v464_v5 = vmul.f32 %v1638_v47, %v1628_v40 }
  0xaa   : > { %1119 = vadd.xlane.f32.xlu0 %v1118_v26  ;;  %v1162_v29 = vadd.f32 %v1161_v28, %v1150_v25  ;;  %vm1184_vm5 = vcmp.gt.f32.partialorder %v1663_v58, %v2233_v31  ;;  %vm1188_vm8 = vcmp.le.f32.partialorder %v1661_v57, %v2236_v32  ;;  %vm1189_vm6 = vcmp.le.f32.partialorder %v1663_v58, %v2236_v32  ;;  %vm1190_vm12 = vmand %vm1181_vm14, %vm1186_vm1 }
  0xab   : > { %1159 = vadd.xlane.f32.xlu1 %v1158_v24  ;;  %v1168_v30 = vadd.f32 %v1167_v27, %v1155_v18  ;;  %vm1191_vm9 = vmand %vm1182_vm4, %vm1187_vm3  ;;  %v1194_v33 = vsel %vm1190_vm12, %v1649_v51, 0.0  ;;  %v465_v47 = vmul.f32 %v1642_v48, %v1630_v41  ;;  %v459_v34 = vadd.f32 %v1630_v41, %v1628_v40 }
  0xac   : > { %v1163_v35 = vadd.f32 %v1162_v29, %v1151_v20  ;;  %vm1192_vm13 = vmand %vm1183_vm11, %vm1188_vm8  ;;  %v1195_v15 = vsel %vm1191_vm9, %v1651_v52, 0.0  ;;  %v1198_v32 = vmul.f32 %v1657_v55, %v1194_v33  ;;  %v1202_v44 = vmul.f32 %v1628_v40, %v1194_v33 }
  0xad   : > { %vm1193_vm15 = vmand %vm1184_vm5, %vm1189_vm6  ;;  %v1196_v48 = vsel %vm1192_vm13, %v1653_v53, 0.0  ;;  %v1199_v51 = vmul.f32 %v1659_v56, %v1195_v15  ;;  %v1206_v45 = vadd.f32 %v1195_v15, %v1194_v33  ;;  %v1203_v16 = vmul.f32 %v1630_v41, %v1195_v15 }
  0xae   : > { %1164 = vadd.xlane.f32.xlu0 %v1163_v35  ;;  %v1197_v23 = vsel %vm1193_vm15, %v1655_v54, 0.0  ;;  %v1200_v52 = vmul.f32 %v1661_v57, %v1196_v48  ;;  %v1204_v55 = vmul.f32 %v1632_v42, %v1196_v48  ;;  %v466_v40 = vmul.f32 %v1644_v49, %v1632_v42 }
  0xaf   : > { %1169 = vadd.xlane.f32.xlu1 %v1168_v30  ;;  %v1201_v31 = vmul.f32 %v1663_v58, %v1197_v23  ;;  %v1211_v46 = vadd.f32 %v1199_v51, %v1198_v32  ;;  %v1207_v53 = vadd.f32 %v1206_v45, %v1196_v48  ;;  %v468_v60 = vadd.f32 %v465_v47, %v464_v5 }
  0xb0   : > { %v1205_v56 = vmul.f32 %v1634_v43, %v1197_v23  ;;  %v1216_v61 = vadd.f32 %v1203_v16, %v1202_v44  ;;  %v460_v54 = vadd.f32 %v1632_v42, %v459_v34  ;;  %v467_v37 = vmul.f32 %v1646_v50, %v1634_v43 }
  0xb1   : > { %v1212_v41 = vadd.f32 %v1211_v46, %v1200_v52  ;;  %v1208_v39 = vadd.f32 %v1207_v53, %v1197_v23  ;;  %v469_v49 = vadd.f32 %v468_v60, %v466_v40  ;;  %vm571_vm10 = vcmp.eq.s32.totalorder %v1602_v2, 1 }
  0xb2   : > { %v1217_v62 = vadd.f32 %v1216_v61, %v1204_v55  ;;  %v461_v58 = vadd.f32 %v1634_v43, %v460_v54  ;;  %vm521_vm2 = vcmp.eq.s32.totalorder %v1602_v2, 0  ;;  %vm621_vm0 = vcmp.eq.s32.totalorder %v1602_v2, 2 }
  0xb3   : > { %v1213_v57 = vadd.f32 %v1212_v41, %v1201_v31  ;;  %1209 = vadd.xlane.f32.xlu0 %v1208_v39  ;;  %v470_v4 = vadd.f32 %v469_v49, %v467_v37  ;;  %vm671_vm7 = vcmp.eq.s32.totalorder %v1602_v2, 3  ;;  %vm721_vm14 = vcmp.eq.s32.totalorder %v1602_v2, 4 }
  0xb4   : > { %v1218_v1 = vadd.f32 %v1217_v62, %v1205_v56  ;;  %vm771_vm4 = vcmp.eq.s32.totalorder %v1602_v2, 5  ;;  %vm821_vm11 = vcmp.eq.s32.totalorder %v1602_v2, 6  ;;  %vm871_vm1 = vcmp.eq.s32.totalorder %v1602_v2, 7 }
  0xb5   : > { %1214 = vadd.xlane.f32.xlu1 %v1213_v57  ;;  %vm921_vm3 = vcmp.eq.s32.totalorder %v1602_v2, 8  ;;  %vm971_vm5 = vcmp.eq.s32.totalorder %v1602_v2, 9  ;;  %vm1021_vm8 = vcmp.eq.s32.totalorder %v1602_v2, 10  ;;  %vm1071_vm6 = vcmp.eq.s32.totalorder %v1602_v2, 11 }
  0xb6   : > { %vm1121_vm12 = vcmp.eq.s32.totalorder %v1602_v2, 12  ;;  %vm1171_vm9 = vcmp.eq.s32.totalorder %v1602_v2, 13  ;;  %vm1221_vm13 = vcmp.eq.s32.totalorder %v1602_v2, 14  ;;  %vm1236_vm15 = vcmask 121856  }
  0xb7   : > { %1219 = vadd.xlane.f32.xlu0 %v1218_v1 }
  0xb9   : > { %462 = vadd.xlane.f32.xlu1 %v461_v58 }
  0xbb   : > { %471 = vadd.xlane.f32.xlu0 %v470_v4 }
  0xd8   : > { %v560_v59 = vpop.xlane.xlu1 %559 }
  0xd9   : > { %v574_v30 = vsel %vm571_vm10, %v560_v59, 0.0 }
  0xdc   : > { %v510_v36 = vpop.xlane.xlu0 %509 }
  0xdd   : > { %v524_v33 = vsel %vm521_vm2, %v510_v36, 0.0 }
  0xde   : > { %v577_v35 = vadd.f32 %v574_v30, %v524_v33 }
  0xe0   : > { %v660_v7 = vpop.xlane.xlu1 %659 }
  0xe1   : > { %v674_v44 = vsel %vm671_vm7, %v660_v7, 0.0 }
  0xe4   : > { %v610_v8 = vpop.xlane.xlu0 %609  ;;  %v520_v42 = vpop.xlane.xlu1 %519 }
  0xe5   : > { %v624_v34 = vsel %vm621_vm0, %v610_v8, 0.0  ;;  %v526_v45 = vsel %vm521_vm2, %v520_v42, 0.0 }
  0xe6   : > { %v627_v48 = vadd.f32 %v624_v34, %v577_v35 }
  0xe8   : > { %v515_v6 = vpop.xlane.xlu0 %514  ;;  %v570_v9 = vpop.xlane.xlu1 %569  ;;  %v677_v56 = vadd.f32 %v674_v44, %v627_v48 }
  0xe9   : > { %v525_v16 = vsel %vm521_vm2, %v515_v6, 0.0  ;;  %v576_v23 = vsel %vm571_vm10, %v570_v9, 0.0 }
  0xea   : > { %v579_v53 = vadd.f32 %v576_v23, %v526_v45 }
  0xec   : > { %v565_v10 = vpop.xlane.xlu0 %564  ;;  %v615_v11 = vpop.xlane.xlu1 %614 }
  0xed   : > { %v575_v15 = vsel %vm571_vm10, %v565_v10, 0.0  ;;  %v625_v52 = vsel %vm621_vm0, %v615_v11, 0.0 }
  0xee   : > { %v578_v55 = vadd.f32 %v575_v15, %v525_v16 }
  0xf0   : > { %v620_v12 = vpop.xlane.xlu0 %619  ;;  %v670_v50 = vpop.xlane.xlu1 %669  ;;  %v628_v60 = vadd.f32 %v625_v52, %v578_v55 }
  0xf1   : > { %v626_v40 = vsel %vm621_vm0, %v620_v12, 0.0  ;;  %v676_v41 = vsel %vm671_vm7, %v670_v50, 0.0  ;;  %vm475_vm0 = vcmask 7168  }
  0xf2   : > { %v629_v62 = vadd.f32 %v626_v40, %v579_v53 }
  0xf4   : > { %v665_v63 = vpop.xlane.xlu0 %664  ;;  %v679_v59 = vadd.f32 %v676_v41, %v629_v62 }
  0xf5   : > { %v675_v31 = vsel %vm671_vm7, %v665_v63, 0.0 }
  0xf6   : > { %v678_v57 = vadd.f32 %v675_v31, %v628_v60 }
  0xf7   : > { %v715_v13 = vpop.xlane.xlu1 %714 }
  0xf8   : > { %v710_v14 = vpop.xlane.xlu0 %709  ;;  %v725_v39 = vsel %vm721_vm14, %v715_v13, 0.0 }
  0xf9   : > { %v724_v46 = vsel %vm721_vm14, %v710_v14, 0.0  ;;  %v728_v36 = vadd.f32 %v725_v39, %v678_v57 }
  0xfa   : > { %v727_v37 = vadd.f32 %v724_v46, %v677_v56 }
  0xfb   : > { %v760_v17 = vpop.xlane.xlu1 %759 }
  0xfc   : > { %v720_v43 = vpop.xlane.xlu0 %719  ;;  %v774_v54 = vsel %vm771_vm4, %v760_v17, 0.0 }
  0xfd   : > { %v726_v1 = vsel %vm721_vm14, %v720_v43, 0.0  ;;  %v777_v7 = vadd.f32 %v774_v54, %v727_v37  ;;  %v1230_v37 = vld [vmem:[#allocation2] sm:$0xff] }
  0xfe   : > { %v729_v9 = vadd.f32 %v726_v1, %v679_v59 }
  0xff   : > { %v770_v0 = vpop.xlane.xlu1 %769 }
 0x100   : > { %v765_v3 = vpop.xlane.xlu0 %764  ;;  %v776_v8 = vsel %vm771_vm4, %v770_v0, 0.0 }
 0x101   : > { %v775_v58 = vsel %vm771_vm4, %v765_v3, 0.0  ;;  %v779_v14 = vadd.f32 %v776_v8, %v729_v9  ;;  %vm1277_vm4 = vcmask (!%p1423_p3), 23552  }
 0x102   : > { %v778_v10 = vadd.f32 %v775_v58, %v728_v36  ;;  %v1231_v36 = vld [vmem:[#allocation2 + $0x8] sm:$0xff] }
 0x104   : > { %v810_v18 = vpop.xlane.xlu0 %809 }
 0x105   : > { %v824_v4 = vsel %vm821_vm11, %v810_v18, 0.0 }
 0x106   : > { %v815_v19 = vpop.xlane.xlu1 %814  ;;  %v827_v11 = vadd.f32 %v824_v4, %v777_v7 }
 0x107   : > { %v825_v42 = vsel %vm821_vm11, %v815_v19, 0.0 }
 0x108   : > { %v828_v17 = vadd.f32 %v825_v42, %v778_v10  ;;  %v457_v10 = vld [vmem:[#allocation3] sm:$0xff] }
 0x109   : > { %v2352_v38 = vpop.xlane.xlu0 %819 }
 0x10a   : > { %v860_v21 = vpop.xlane.xlu1 %859  ;;  %v826_v50 = vsel %vm821_vm11, %v2352_v38, 0.0 }
 0x10b   : > { %v874_v6 = vsel %vm871_vm1, %v860_v21, 0.0  ;;  %v829_v38 = vadd.f32 %v826_v50, %v779_v14 }
 0x10c   : > { %v877_v43 = vadd.f32 %v874_v6, %v827_v11  ;;  %v1232_v11 = vld [vmem:[#allocation2 + $0x10] sm:$0xff] }
 0x10e   : > { %v865_v22 = vpop.xlane.xlu0 %864  ;;  %v2354_v24 = vpop.xlane.xlu1 %869 }
 0x10f   : > { %v875_v63 = vsel %vm871_vm1, %v865_v22, 0.0  ;;  %v876_v3 = vsel %vm871_vm1, %v2354_v24, 0.0 }
 0x110   : > { %v878_v21 = vadd.f32 %v875_v63, %v828_v17  ;;  %v879_v33 = vadd.f32 %v876_v3, %v829_v38 }
 0x114   : > { %v910_v25 = vpop.xlane.xlu0 %909 }
 0x115   : > { %v924_v13 = vsel %vm921_vm3, %v910_v25, 0.0 }
 0x116   : > { %v2356_v20 = vpop.xlane.xlu1 %914  ;;  %v927_v22 = vadd.f32 %v924_v13, %v877_v43  ;;  %v458_v13 = vld [vmem:[#allocation3 + $0x8] sm:$0xff] }
 0x117   : > { %v925_v18 = vsel %vm921_vm3, %v2356_v20, 0.0 }
 0x119   : > { %v2358_v26 = vpop.xlane.xlu0 %919 }
 0x11a   : > { %v2360_v27 = vpop.xlane.xlu1 %959  ;;  %v926_v25 = vsel %vm921_vm3, %v2358_v26, 0.0 }
 0x11b   : > { %v974_v19 = vsel %vm971_vm5, %v2360_v27, 0.0  ;;  %v928_v27 = vadd.f32 %v925_v18, %v878_v21 }
 0x11c   : > { %v977_v34 = vadd.f32 %v974_v19, %v927_v22  ;;  %v1525_v19 = vmov (!%p1423_p3), 0  }
 0x11d   : > { %v2362_v28 = vpop.xlane.xlu0 %964  ;;  %1473 = vset.pattern.permute.xlu1 (!%p1423_p3), %v1525_v19  ;;  %1474 = vset.pattern.permute.xlu0 (!%p1423_p3), %v1525_v19 }
 0x11e   : > { %v2364_v5 = vpop.xlane.xlu1 %969  ;;  %v975_v24 = vsel %vm971_vm5, %v2362_v28, 0.0 }
 0x11f   : > { %v976_v15 = vsel %vm971_vm5, %v2364_v5, 0.0  ;;  %v978_v44 = vadd.f32 %v975_v24, %v928_v27 }
 0x122   : > { %v2369_v29 = vpop.xlane.xlu0 %1009 }
 0x123   : > { %v1024_v20 = vsel %vm1021_vm8, %v2369_v29, 0.0  ;;  %v929_v29 = vadd.f32 %v926_v25, %v879_v33 }
 0x124   : > { %v2375_v47 = vpop.xlane.xlu1 %1014  ;;  %v1027_v48 = vadd.f32 %v1024_v20, %v977_v34 }
 0x125   : > { %v1025_v26 = vsel %vm1021_vm8, %v2375_v47, 0.0  ;;  %v979_v23 = vadd.f32 %v976_v15, %v929_v29 }
 0x126   : > { %v1028_v52 = vadd.f32 %v1025_v26, %v978_v44 }
 0x127   : > { %v2382_v32 = vpop.xlane.xlu0 %1019 }
 0x128   : > { %v2387_v51 = vpop.xlane.xlu1 %1059  ;;  %v1026_v45 = vsel %vm1021_vm8, %v2382_v32, 0.0 }
 0x129   : > { %v1074_v28 = vsel %vm1071_vm6, %v2387_v51, 0.0  ;;  %v1029_v46 = vadd.f32 %v1026_v45, %v979_v23 }
 0x12a   : > { %v1077_v55 = vadd.f32 %v1074_v28, %v1027_v48 }
 0x12c   : > { %v1065_v61 = vpop.xlane.xlu0 %1064  ;;  %v1070_v49 = vpop.xlane.xlu1 %1069 }
 0x12d   : > { %v1075_v5 = vsel %vm1071_vm6, %v1065_v61, 0.0  ;;  %v1076_v40 = vsel %vm1071_vm6, %v1070_v49, 0.0 }
 0x12e   : > { %v1078_v53 = vadd.f32 %v1075_v5, %v1028_v52  ;;  %v1079_v41 = vadd.f32 %v1076_v40, %v1029_v46 }
 0x132   : > { %v1110_v12 = vpop.xlane.xlu0 %1109 }
 0x133   : > { %v1124_v16 = vsel %vm1121_vm12, %v1110_v12, 0.0 }
 0x134   : > { %v1115_v0 = vpop.xlane.xlu1 %1114  ;;  %v1127_v60 = vadd.f32 %v1124_v16, %v1077_v55 }
 0x135   : > { %v1125_v31 = vsel %vm1121_vm12, %v1115_v0, 0.0 }
 0x136   : > { %v1128_v39 = vadd.f32 %v1125_v31, %v1078_v53 }
 0x137   : > { %v1120_v30 = vpop.xlane.xlu0 %1119 }
 0x138   : > { %v1160_v35 = vpop.xlane.xlu1 %1159  ;;  %v1126_v56 = vsel %vm1121_vm12, %v1120_v30, 0.0 }
 0x139   : > { %v1174_v32 = vsel %vm1171_vm9, %v1160_v35, 0.0  ;;  %v1129_v1 = vadd.f32 %v1126_v56, %v1079_v41 }
 0x13a   : > { %v1177_v54 = vadd.f32 %v1174_v32, %v1127_v60 }
 0x13b   : > { %v1165_v47 = vpop.xlane.xlu0 %1164 }
 0x13c   : > { %v1170_v51 = vpop.xlane.xlu1 %1169  ;;  %v1175_v61 = vsel %vm1171_vm9, %v1165_v47, 0.0 }
 0x13d   : > { %v1176_v57 = vsel %vm1171_vm9, %v1170_v51, 0.0  ;;  %v1178_v58 = vadd.f32 %v1175_v61, %v1128_v39 }
 0x13e   : > { %v1179_v8 = vadd.f32 %v1176_v57, %v1129_v1 }
 0x140   : > { %v1210_v62 = vpop.xlane.xlu0 %1209 }
 0x141   : > { %v1224_v49 = vsel %vm1221_vm13, %v1210_v62, 0.0 }
 0x142   : > { %v1215_v4 = vpop.xlane.xlu1 %1214  ;;  %v1227_v59 = vadd.f32 %v1224_v49, %v1177_v54 }
 0x143   : > { %v1225_v7 = vsel %vm1221_vm13, %v1215_v4, 0.0 }
 0x144   : > { %v1228_v42 = vadd.f32 %v1225_v7, %v1178_v58  ;;  %v1233_v6 = vadd.f32 %v1230_v37, %v1227_v59  ;;  %v1220_v9 = vpop.xlane.xlu0 %1219 }
 0x145   : > { %v1226_v12 = vsel %vm1221_vm13, %v1220_v9, 0.0  ;;  %1243 = sbr.rel (%p1423_p3) target bundleno = 501 (0x1f5), region = 52 }
 0x146   : > { %v1234_v50 = vadd.f32 %v1231_v36, %v1228_v42  ;;  %1237 = vst.msk [vmem:[#allocation2] sm:$0xff] %vm1236_vm15, %v1233_v6  ;;  %v1229_v63 = vadd.f32 %v1226_v12, %v1179_v8  ;;  %v463_v14 = vpop.xlane.xlu1 %462 }
 0x147   : > { %v473_v17 = vadd.f32 %v463_v14, %v457_v10 }
 0x148   : > { %1238 = vst.msk [vmem:[#allocation2 + $0x8] sm:$0xff] %vm1236_vm15, %v1234_v50  ;;  %v1235_v43 = vadd.f32 %v1232_v11, %v1229_v63  ;;  %v472_v0 = vpop.xlane.xlu0 %471 }
 0x149   : > { %v474_v3 = vadd.f32 %v472_v0, %v458_v13  ;;  %476 = vst.msk [vmem:[#allocation3] sm:$0xff] %vm475_vm0, %v473_v17 }
 0x14a   : > { %1239 = vst.msk [vmem:[#allocation2 + $0x10] sm:$0xff] %vm1236_vm15, %v1235_v43 }
 0x14b   : > { %477 = vst.msk [vmem:[#allocation3 + $0x8] sm:$0xff] %vm475_vm0, %v474_v3 }
 0x14d   : > { %v1244_v18 = vld [vmem:[#allocation2] sm:$0xff] }
 0x14e   : > { %vm1247_vm7 = vcmp.gt.f32.partialorder %v1244_v18, 0.0  ;;  %v1253_v27 = vmul.f32 0.0015625, %v1244_v18 }
 0x14f   : > { %v1248_v21 = vsel %vm1247_vm7, %v1244_v18, 1.0  ;;  %v1245_v25 = vld [vmem:[#allocation2 + $0x8] sm:$0xff] }
 0x150   : > { %v1263_v38 = vld [vmem:[#allocation3] sm:$0xff]  ;;  %1475 = vrcp.f32 %v1248_v21 }
 0x151   : > { %vm1265_vm14 = vcmp.gt.f32.partialorder %v1263_v38, 0.0  ;;  %v1246_v24 = vld [vmem:[#allocation2 + $0x10] sm:$0xff] }
 0x152   : > { %v1266_v22 = vsel %vm1265_vm14, %v1263_v38, 1.0  ;;  %v1250_v20 = vsub.f32 %v1245_v25, %v1246_v24  ;;  %v1264_v30 = vld [vmem:[#allocation3 + $0x8] sm:$0xff] }
 0x153   : > { %1477 = vrcp.f32 %v1266_v22 }
 0x15a   : > { %v1476_v33 = vpop.eup %1475 }
 0x15b   : > { %v1251_v35 = vmul.f32 %v1476_v33, %v1250_v20 }
 0x15d   : > { %v1478_v34 = vpop.eup %1477  ;;  %v1252_v26 = vsel %vm1247_vm7, %v1251_v35, 0.0 }
 0x15e   : > { %v1268_v15 = vmul.f32 %v1478_v34, %v1264_v30  ;;  %v1259_v28 = vmul.f32 %v1253_v27, %v1252_v26  ;;  %v1254_v29 = vand.u32 2147483647, %v1252_v26 }
 0x160   : > { %v1269_v44 = vsel %vm1265_vm14, %v1268_v15, 0.0  ;;  %v1260_v48 = vsel %vm1236_vm15, %v1259_v28, 0.0  ;;  %v1255_v45 = vmul.f32 %v1254_v29, %v1253_v27 }
 0x161   : > { %1272 = vperm.xlu1 %1473, %v1269_v44   ;;  %1261 = vadd.xlane.f32.xlu0 %v1260_v48 }
 0x162   : > { %v1256_v5 = vsel %vm1236_vm15, %v1255_v45, 0.0 }
 0x165   : > { %1257 = vadd.xlane.f32.xlu0 %v1256_v5 }
 0x1e0   : > { %v1273_v47 = vpop.permute.xlu1 %1272 }
 0x1ee   : > { %v1262_v16 = vpop.xlane.xlu0 %1261 }
 0x1ef   : > { %v1275_v23 = vsel %vm571_vm10, %v1262_v16, %v1273_v47 }
 0x1f2   : > { %v1258_v52 = vpop.xlane.xlu0 %1257 }
 0x1f3   : > { %v1276_v55 = vsel %vm521_vm2, %v1258_v52, %v1275_v23 }
 0x1f4   : > { %1278 = vst.msk [vmem:[%s2521_s5] sm:$0xff] %vm1277_vm4, %v1276_v55 }
 0x1f5 PF: > { %s16_s20 = sadd.s32 1, %s1520_s20   ;;  %s2525_s18 = smov %s1516_s19 }
 0x1f6   : > { %p13_p4 = scmp.ge.s32.totalorder %s16_s20, 4   ;;  %s2526_s19 = smov %s2528_s22 }
 0x1f8   :  { %15 = sbr.rel (!%p13_p4) target bundleno = 2 (0x2), region = 92 }
 0x1ff   :  { %1298 = vsyncpa [#allocation5], 1 }
 0x200   :  { %1300 = vsyncpa [#allocation5 + $0x1], 1 }

</bundles_post_ra>
